<compile_context>
chip_gen: v5e
topology: v5e:2x2
jax: 0.10.0
libtpu: 0.0.40
codegen_flags: <defaults>
</compile_context>

<pallas_src>
import jax
import jax.numpy as jnp
from jax.experimental import pallas as pl
from jax.experimental.pallas import tpu as pltpu

HIDDEN1_UNITS = 400
HIDDEN2_UNITS = 400
HIDDEN3_UNITS = 400

LANE = 128            # lane width: pad all feature dims to a multiple of this
SUBLANE = 8           # sublane width: pad batch to a multiple of this
MAX_BATCH_TILE = 256  # rows of x processed per grid step at large batch


def _round_up(n, m):
    return ((n + m - 1) // m) * m


# ----------------------------------------------------------------------------
# Kernel
# ----------------------------------------------------------------------------
def _mlp_kernel(x_ref,
                w1_ref, b1_ref,
                w2_ref, b2_ref,
                w3_ref, b3_ref,
                wo_ref, bo_ref,
                o_ref):
    """One batch tile: 3x (matmul + bias + ReLU) + final matmul + bias.

    Weights arrive as bf16 (lane-padded), biases as f32.  Every matmul uses the
    MXU with f32 accumulation; activations are re-quantized to bf16 between
    layers so every MXU input is bf16-native.
    """
    h = x_ref[...]  # already bf16
    h = jnp.maximum(
        jnp.dot(h, w1_ref[...], preferred_element_type=jnp.float32) + b1_ref[...],
        0.0).astype(jnp.bfloat16)
    h = jnp.maximum(
        jnp.dot(h, w2_ref[...], preferred_element_type=jnp.float32) + b2_ref[...],
        0.0).astype(jnp.bfloat16)
    h = jnp.maximum(
        jnp.dot(h, w3_ref[...], preferred_element_type=jnp.float32) + b3_ref[...],
        0.0).astype(jnp.bfloat16)
    out = jnp.dot(h, wo_ref[...], preferred_element_type=jnp.float32) + bo_ref[...]
    o_ref[...] = out.astype(o_ref.dtype)


# ----------------------------------------------------------------------------
# Parameter handling
# ----------------------------------------------------------------------------
def init_params(key, state_dim, action_dim):
    """f32 params mimicking PyTorch nn.Linear default init U[-1/sqrt(fan_in), +].

    Weights stored already transposed: (in_features, out_features).
    """
    dims = [
        (state_dim + action_dim, HIDDEN1_UNITS),
        (HIDDEN1_UNITS, HIDDEN2_UNITS),
        (HIDDEN2_UNITS, HIDDEN3_UNITS),
        (HIDDEN3_UNITS, 2 * state_dim),
    ]
    params = []
    for fan_in, fan_out in dims:
        key, kw, kb = jax.random.split(key, 3)
        bound = 1.0 / jnp.sqrt(fan_in)
        w = jax.random.uniform(kw, (fan_in, fan_out), jnp.float32, -bound, bound)
        b = jax.random.uniform(kb, (fan_out,), jnp.float32, -bound, bound)
        params.append((w, b))
    return params


def pack_params(params):
    """Zero-pad every layer to lane multiples; weights -> bf16, biases -> f32 (1, N)."""
    packed = []
    for w, b in params:
        fi, fo = w.shape
        fi_p, fo_p = _round_up(fi, LANE), _round_up(fo, LANE)
        w_pad = jnp.zeros((fi_p, fo_p), jnp.float32).at[:fi, :fo].set(w)
        b_pad = jnp.zeros((1, fo_p), jnp.float32).at[0, :fo].set(b)
        packed.append((w_pad.astype(jnp.bfloat16), b_pad))
    return packed


# ----------------------------------------------------------------------------
# Pallas forward
# ----------------------------------------------------------------------------
def network_forward(x, packed_params, out_dim):
    """x: (batch, state_dim + action_dim) f32 -> (batch, out_dim) f32."""
    (w1, b1), (w2, b2), (w3, b3), (wo, bo) = packed_params
    batch, feat = x.shape
    in_pad = w1.shape[0]
    out_pad = wo.shape[1]

    # Adaptive batch tiling: tiny batches -> single grid step (no 128-row
    # padding waste); big batches -> 256-row tiles, batch axis "parallel".
    batch_pad8 = _round_up(batch, SUBLANE)
    if batch_pad8 <= MAX_BATCH_TILE:
        tile = batch_pad8
        batch_pad = batch_pad8
    else:
        tile = MAX_BATCH_TILE
        batch_pad = _round_up(batch, MAX_BATCH_TILE)
    n_tiles = batch_pad // tile

    # Zero-pad the input batch/features; cast to bf16 in the wrapper so the
    # streamed activation DMA is half-width (kernel math is bf16 regardless).
    x_pad = (jnp.zeros((batch_pad, in_pad), jnp.float32)
             .at[:batch, :feat].set(x)
             .astype(jnp.bfloat16))

    flops = 2 * batch_pad * (w1.shape[0] * w1.shape[1]
                             + w2.shape[0] * w2.shape[1]
                             + w3.shape[0] * w3.shape[1]
                             + wo.shape[0] * wo.shape[1])
    bytes_accessed = (x_pad.size * 2 + batch_pad * out_pad * 4
                      + sum(w.size * 2 + b.size * 4 for w, b in packed_params))

    # Weights/biases: constant index_map -> DMA'd once, VMEM-resident.
    const_spec = lambda shape: pl.BlockSpec(shape, lambda i: (0, 0))

    out_full = pl.pallas_call(
        _mlp_kernel,
        out_shape=jax.ShapeDtypeStruct((batch_pad, out_pad), jnp.float32),
        grid=(n_tiles,),
        in_specs=[
            pl.BlockSpec((tile, in_pad), lambda i: (i, 0)),  # stream x tiles
            const_spec(w1.shape), const_spec(b1.shape),
            const_spec(w2.shape), const_spec(b2.shape),
            const_spec(w3.shape), const_spec(b3.shape),
            const_spec(wo.shape), const_spec(bo.shape),
        ],
        out_specs=pl.BlockSpec((tile, out_pad), lambda i: (i, 0)),
        compiler_params=pltpu.CompilerParams(
            dimension_semantics=("parallel",)),
        cost_estimate=pl.CostEstimate(
            flops=int(flops), transcendentals=0,
            bytes_accessed=int(bytes_accessed)),
    )(x_pad, w1, b1, w2, b2, w3, b3, wo, bo)

    return out_full[:batch, :out_dim]


# ----------------------------------------------------------------------------
# References
# ----------------------------------------------------------------------------
def network_forward_ref_quant(x, packed_params, out_dim):
    """f32-math reference mirroring the kernel's bf16 weight/activation quantization."""
    (w1, b1), (w2, b2), (w3, b3), (wo, bo) = packed_params
    batch, feat = x.shape
    in_pad = w1.shape[0]
    h = jnp.zeros((batch, in_pad), jnp.float32).at[:, :feat].set(x)
    h = h.astype(jnp.bfloat16).astype(jnp.float32)
    for w, b in ((w1, b1), (w2, b2), (w3, b3)):
        h = jnp.maximum(h @ w.astype(jnp.float32) + b, 0.0)
        h = h.astype(jnp.bfloat16).astype(jnp.float32)
    out = h @ wo.astype(jnp.float32) + bo
    return out[:, :out_dim]


def network_forward_ref_fp32(x, params):
    """Pure f32 reference on the original (unquantized, unpadded) parameters."""
    h = x
    for w, b in params[:-1]:
        h = jnp.maximum(h @ w + b[None, :], 0.0)
    w, b = params[-1]
    return h @ w + b[None, :]


# ----------------------------------------------------------------------------
if __name__ == "__main__":
    state_dim = 8
    action_dim = 4
    batch = 8

    key = jax.random.PRNGKey(0)
    key, kx = jax.random.split(key)
    x = jax.random.normal(kx, (batch, state_dim + action_dim), jnp.float32)

    params = init_params(key, state_dim, action_dim)
    packed = pack_params(params)
    out_dim = 2 * state_dim

    out = jax.block_until_ready(network_forward(x, packed, out_dim))
    assert out.shape == (batch, out_dim), out.shape

    ref_q = network_forward_ref_quant(x, packed, out_dim)
    ref_f = network_forward_ref_fp32(x, params)
    assert jnp.allclose(out, ref_q, atol=1e-2, rtol=1e-2), "mismatch vs bf16-mirrored reference"
    assert jnp.allclose(out, ref_f, atol=5e-2, rtol=5e-2), "mismatch vs fp32 reference"

    print("KERNEL_OK")
</pallas_src>

<mosaic_0001>
module attributes {stable_mosaic.version = 11 : i64} {
  func.func @_mlp_kernel(%arg0: i32, %arg1: memref<8x128xbf16, #tpu.memory_space<vmem>>, %arg2: memref<128x512xbf16, #tpu.memory_space<vmem>>, %arg3: memref<1x512xf32, #tpu.memory_space<vmem>>, %arg4: memref<512x512xbf16, #tpu.memory_space<vmem>>, %arg5: memref<1x512xf32, #tpu.memory_space<vmem>>, %arg6: memref<512x512xbf16, #tpu.memory_space<vmem>>, %arg7: memref<1x512xf32, #tpu.memory_space<vmem>>, %arg8: memref<512x128xbf16, #tpu.memory_space<vmem>>, %arg9: memref<1x128xf32, #tpu.memory_space<vmem>>, %arg10: memref<8x128xf32, #tpu.memory_space<vmem>>) attributes {dimension_semantics = [#tpu.dimension_semantics<parallel>], iteration_bounds = array<i64: 1>, scalar_prefetch = 0 : i64, scratch_operands = 0 : i64, tpu.core_type = #tpu.core_type<tc>, window_params = [{transform_indices = @transform_0, window_bounds = array<i64: 8, 128>}, {pipeline_mode = #tpu.pipeline_mode<synchronous>, transform_indices = @transform_1, window_bounds = array<i64: 128, 512>}, {pipeline_mode = #tpu.pipeline_mode<synchronous>, transform_indices = @transform_2, window_bounds = array<i64: 1, 512>}, {pipeline_mode = #tpu.pipeline_mode<synchronous>, transform_indices = @transform_3, window_bounds = array<i64: 512, 512>}, {pipeline_mode = #tpu.pipeline_mode<synchronous>, transform_indices = @transform_4, window_bounds = array<i64: 1, 512>}, {pipeline_mode = #tpu.pipeline_mode<synchronous>, transform_indices = @transform_5, window_bounds = array<i64: 512, 512>}, {pipeline_mode = #tpu.pipeline_mode<synchronous>, transform_indices = @transform_6, window_bounds = array<i64: 1, 512>}, {pipeline_mode = #tpu.pipeline_mode<synchronous>, transform_indices = @transform_7, window_bounds = array<i64: 512, 128>}, {pipeline_mode = #tpu.pipeline_mode<synchronous>, transform_indices = @transform_8, window_bounds = array<i64: 1, 128>}, {transform_indices = @transform_9, window_bounds = array<i64: 8, 128>}]} {
    %c0 = arith.constant 0 : index
    %c0_0 = arith.constant 0 : index
    %0 = vector.load %arg1[%c0, %c0_0] : memref<8x128xbf16, #tpu.memory_space<vmem>>, vector<8x128xbf16>
    %c0_1 = arith.constant 0 : index
    %c0_2 = arith.constant 0 : index
    %1 = vector.load %arg2[%c0_1, %c0_2] : memref<128x512xbf16, #tpu.memory_space<vmem>>, vector<128x512xbf16>
    %cst = arith.constant dense<0.000000e+00> : vector<8x512xf32>
    %2 = tpu.matmul %0, %1, %cst {dimension_numbers = #tpu.dot_dimension_numbers<[1], [0], [0], [1], [0, 0, 1, 1], [], []>} : vector<8x128xbf16>, vector<128x512xbf16>, vector<8x512xf32> -> vector<8x512xf32>
    %c0_3 = arith.constant 0 : index
    %c0_4 = arith.constant 0 : index
    %3 = vector.load %arg3[%c0_3, %c0_4] : memref<1x512xf32, #tpu.memory_space<vmem>>, vector<1x512xf32>
    %4 = vector.broadcast %3 : vector<1x512xf32> to vector<8x512xf32>
    %5 = arith.addf %2, %4 : vector<8x512xf32>
    %cst_5 = arith.constant 0.000000e+00 : f32
    %6 = vector.broadcast %cst_5 : f32 to vector<8x512xf32>
    %7 = arith.maximumf %5, %6 : vector<8x512xf32>
    %8 = arith.truncf %7 : vector<8x512xf32> to vector<8x512xbf16>
    %c0_6 = arith.constant 0 : index
    %c0_7 = arith.constant 0 : index
    %9 = vector.load %arg4[%c0_6, %c0_7] : memref<512x512xbf16, #tpu.memory_space<vmem>>, vector<512x512xbf16>
    %cst_8 = arith.constant dense<0.000000e+00> : vector<8x512xf32>
    %10 = tpu.matmul %8, %9, %cst_8 {dimension_numbers = #tpu.dot_dimension_numbers<[1], [0], [0], [1], [0, 0, 1, 1], [], []>} : vector<8x512xbf16>, vector<512x512xbf16>, vector<8x512xf32> -> vector<8x512xf32>
    %c0_9 = arith.constant 0 : index
    %c0_10 = arith.constant 0 : index
    %11 = vector.load %arg5[%c0_9, %c0_10] : memref<1x512xf32, #tpu.memory_space<vmem>>, vector<1x512xf32>
    %12 = vector.broadcast %11 : vector<1x512xf32> to vector<8x512xf32>
    %13 = arith.addf %10, %12 : vector<8x512xf32>
    %cst_11 = arith.constant 0.000000e+00 : f32
    %14 = vector.broadcast %cst_11 : f32 to vector<8x512xf32>
    %15 = arith.maximumf %13, %14 : vector<8x512xf32>
    %16 = arith.truncf %15 : vector<8x512xf32> to vector<8x512xbf16>
    %c0_12 = arith.constant 0 : index
    %c0_13 = arith.constant 0 : index
    %17 = vector.load %arg6[%c0_12, %c0_13] : memref<512x512xbf16, #tpu.memory_space<vmem>>, vector<512x512xbf16>
    %cst_14 = arith.constant dense<0.000000e+00> : vector<8x512xf32>
    %18 = tpu.matmul %16, %17, %cst_14 {dimension_numbers = #tpu.dot_dimension_numbers<[1], [0], [0], [1], [0, 0, 1, 1], [], []>} : vector<8x512xbf16>, vector<512x512xbf16>, vector<8x512xf32> -> vector<8x512xf32>
    %c0_15 = arith.constant 0 : index
    %c0_16 = arith.constant 0 : index
    %19 = vector.load %arg7[%c0_15, %c0_16] : memref<1x512xf32, #tpu.memory_space<vmem>>, vector<1x512xf32>
    %20 = vector.broadcast %19 : vector<1x512xf32> to vector<8x512xf32>
    %21 = arith.addf %18, %20 : vector<8x512xf32>
    %cst_17 = arith.constant 0.000000e+00 : f32
    %22 = vector.broadcast %cst_17 : f32 to vector<8x512xf32>
    %23 = arith.maximumf %21, %22 : vector<8x512xf32>
    %24 = arith.truncf %23 : vector<8x512xf32> to vector<8x512xbf16>
    %c0_18 = arith.constant 0 : index
    %c0_19 = arith.constant 0 : index
    %25 = vector.load %arg8[%c0_18, %c0_19] : memref<512x128xbf16, #tpu.memory_space<vmem>>, vector<512x128xbf16>
    %cst_20 = arith.constant dense<0.000000e+00> : vector<8x128xf32>
    %26 = tpu.matmul %24, %25, %cst_20 {dimension_numbers = #tpu.dot_dimension_numbers<[1], [0], [0], [1], [0, 0, 1, 1], [], []>} : vector<8x512xbf16>, vector<512x128xbf16>, vector<8x128xf32> -> vector<8x128xf32>
    %c0_21 = arith.constant 0 : index
    %c0_22 = arith.constant 0 : index
    %27 = vector.load %arg9[%c0_21, %c0_22] : memref<1x128xf32, #tpu.memory_space<vmem>>, vector<1x128xf32>
    %28 = vector.broadcast %27 : vector<1x128xf32> to vector<8x128xf32>
    %29 = arith.addf %26, %28 : vector<8x128xf32>
    %c0_23 = arith.constant 0 : index
    %c0_24 = arith.constant 0 : index
    %30 = vector.load %arg10[%c0_23, %c0_24] : memref<8x128xf32, #tpu.memory_space<vmem>>, vector<8x128xf32>
    tpu.vector_store %arg10[%c0_23, %c0_24], %29 {strides = array<i32>} : memref<8x128xf32, #tpu.memory_space<vmem>>, vector<8x128xf32>,
    return
  }
  func.func @transform_0(%arg0: i32) -> (i32, i32) {
    %c0_i32 = arith.constant 0 : i32
    %c0_i32_0 = arith.constant 0 : i32
    return %arg0, %c0_i32 : i32, i32
  }
  func.func @transform_1(%arg0: i32) -> (i32, i32) {
    %c0_i32 = arith.constant 0 : i32
    %c0_i32_0 = arith.constant 0 : i32
    %c0_i32_1 = arith.constant 0 : i32
    return %c0_i32, %c0_i32_0 : i32, i32
  }
  func.func @transform_2(%arg0: i32) -> (i32, i32) {
    %c0_i32 = arith.constant 0 : i32
    %c0_i32_0 = arith.constant 0 : i32
    %c0_i32_1 = arith.constant 0 : i32
    return %c0_i32, %c0_i32_0 : i32, i32
  }
  func.func @transform_3(%arg0: i32) -> (i32, i32) {
    %c0_i32 = arith.constant 0 : i32
    %c0_i32_0 = arith.constant 0 : i32
    %c0_i32_1 = arith.constant 0 : i32
    return %c0_i32, %c0_i32_0 : i32, i32
  }
  func.func @transform_4(%arg0: i32) -> (i32, i32) {
    %c0_i32 = arith.constant 0 : i32
    %c0_i32_0 = arith.constant 0 : i32
    %c0_i32_1 = arith.constant 0 : i32
    return %c0_i32, %c0_i32_0 : i32, i32
  }
  func.func @transform_5(%arg0: i32) -> (i32, i32) {
    %c0_i32 = arith.constant 0 : i32
    %c0_i32_0 = arith.constant 0 : i32
    %c0_i32_1 = arith.constant 0 : i32
    return %c0_i32, %c0_i32_0 : i32, i32
  }
  func.func @transform_6(%arg0: i32) -> (i32, i32) {
    %c0_i32 = arith.constant 0 : i32
    %c0_i32_0 = arith.constant 0 : i32
    %c0_i32_1 = arith.constant 0 : i32
    return %c0_i32, %c0_i32_0 : i32, i32
  }
  func.func @transform_7(%arg0: i32) -> (i32, i32) {
    %c0_i32 = arith.constant 0 : i32
    %c0_i32_0 = arith.constant 0 : i32
    %c0_i32_1 = arith.constant 0 : i32
    return %c0_i32, %c0_i32_0 : i32, i32
  }
  func.func @transform_8(%arg0: i32) -> (i32, i32) {
    %c0_i32 = arith.constant 0 : i32
    %c0_i32_0 = arith.constant 0 : i32
    %c0_i32_1 = arith.constant 0 : i32
    return %c0_i32, %c0_i32_0 : i32, i32
  }
  func.func @transform_9(%arg0: i32) -> (i32, i32) {
    %c0_i32 = arith.constant 0 : i32
    %c0_i32_0 = arith.constant 0 : i32
    return %arg0, %c0_i32 : i32, i32
  }
}

</mosaic_0001>

<bundles_post_ra>
// kernel: tpu_custom_call.1
= control target key start
LH: loop header
LB: loop body
LE: loop exit
PB: predicated region body
PF: predicated region fallthrough
CT: control target
= control target key end

     0   :  { %14 = vsyncpa [#allocation3], 0  ;;  %s4699_s0 = inlined_call_operand.hbm [shape: bf16[8,128], index: 0, kind: input, shape index: {}]   ;;  %s4700_s1 = inlined_call_operand.hbm [shape: bf16[128,512], index: 1, kind: input, shape index: {}]   ;;  %s4701_s2 = inlined_call_operand.hbm [shape: f32[1,512], index: 2, kind: input, shape index: {}]   ;;  %s4702_s3 = inlined_call_operand.hbm [shape: bf16[512,512], index: 3, kind: input, shape index: {}]   ;;  %s4703_s4 = inlined_call_operand.hbm [shape: f32[1,512], index: 4, kind: input, shape index: {}]   ;;  %s4704_s5 = inlined_call_operand.hbm [shape: bf16[512,512], index: 5, kind: input, shape index: {}]   ;;  %s4705_s6 = inlined_call_operand.vmem [shape: f32[1,512], index: 6, kind: input, shape index: {}]   ;;  %s4706_s7 = inlined_call_operand.hbm [shape: bf16[512,128], index: 7, kind: input, shape index: {}]   ;;  %s4707_s8 = inlined_call_operand.vmem [shape: f32[1,128], index: 8, kind: input, shape index: {}]   ;;  %s4708_s9 = inlined_call_operand.hbm [shape: f32[8,128], index: 9, kind: output, shape index: {}]  }
   0x1   :  { %15 = vsyncpa [#allocation6], 0 }
   0x2   :  { %16 = vsyncpa [#allocation9], 0 }
   0x3   :  { %17 = vsyncpa [#allocation12], 0  ;;  %s34_s11 = sshll.u32 %s4700_s1, 4  ;;  %s35_s11 = int_to_ptr.hbm [resolvable:$true] %s34_s11 }
   0x4   :  { %18 = vsyncpa [#allocation4], 0  ;;  %s4535_s12 = smov [#allocation5]   ;;  %s58_s16 = sshll.u32 %s4702_s3, 4  ;;  %s59_s16 = int_to_ptr.hbm [resolvable:$true] %s58_s16 }
   0x5   :  { %s36_s13 = sshll.u32 %s4535_s12, 4  ;;  %s4536_s17 = smov 256   ;;  %s37_s13 = int_to_ptr.vmem [resolvable:$true] %s36_s13 }
   0x6   :  { %s4537_s18 = smov 16   ;;  %s4538_s19 = smov [#allocation8]  }
   0x7   :  { %42 = dma.hbm_to_vmem [thread:$0]  %s35_s11, 4096, %s37_s13, [#allocation6], %s4536_s17, %s4536_s17, %s4537_s18  }
   0x8   :  { %s60_s20 = sshll.u32 %s4538_s19, 4  ;;  %s82_s23 = sshll.u32 %s4704_s5, 4  ;;  %s61_s20 = int_to_ptr.vmem [resolvable:$true] %s60_s20  ;;  %s83_s23 = int_to_ptr.hbm [resolvable:$true] %s82_s23 }
   0x9   :  { %66 = dma.hbm_to_vmem [thread:$0]  %s59_s16, 16384, %s61_s20, [#allocation9], %s4536_s17, %s4536_s17, %s4537_s18  }
   0xa   :  { %s24_s25 = sshll.u32 %s4699_s0, 4  ;;  %s4539_s26 = smov [#allocation11]   ;;  %s25_s25 = int_to_ptr.hbm [resolvable:$true] %s24_s25 }
   0xb   :  { %s84_s27 = sshll.u32 %s4539_s26, 4  ;;  %s4540_s3 = smov [#allocation2]   ;;  %s85_s27 = int_to_ptr.vmem [resolvable:$true] %s84_s27 }
   0xc   :  { %90 = dma.hbm_to_vmem [thread:$0]  %s83_s23, 16384, %s85_s27, [#allocation12], %s4536_s17, %s4536_s17, %s4537_s18  }
   0xd   :  { %s26_s28 = sshll.u32 %s4540_s3, 4  ;;  %s48_s10 = sshll.u32 %s4701_s2, 4  ;;  %s27_s28 = int_to_ptr.vmem [resolvable:$true] %s26_s28  ;;  %s49_s10 = int_to_ptr.hbm [resolvable:$true] %s48_s10 }
   0xe   :  { %29 = dma.hbm_to_vmem [thread:$0]  %s25_s25, 64, %s27_s28, [#allocation3]  }
   0xf   :  { %s72_s12 = sshll.u32 %s4703_s4, 4  ;;  %s4541_s13 = smov [#allocation7]   ;;  %s73_s12 = int_to_ptr.hbm [resolvable:$true] %s72_s12 }
  0x10   :  { %s50_s0 = sshll.u32 %s4541_s13, 4  ;;  %s4542_s14 = smov [#allocation10]   ;;  %s51_s0 = int_to_ptr.vmem [resolvable:$true] %s50_s0 }
  0x11   :  { %53 = dma.hbm_to_vmem [thread:$0]  %s49_s10, 64, %s51_s0, [#allocation6]  }
  0x12   :  { %s74_s15 = sshll.u32 %s4542_s14, 4  ;;  %s97_s18 = sshll.u32 %s4706_s7, 4  ;;  %s75_s15 = int_to_ptr.vmem [resolvable:$true] %s74_s15  ;;  %s98_s18 = int_to_ptr.hbm [resolvable:$true] %s97_s18 }
  0x13   :  { %77 = dma.hbm_to_vmem [thread:$0]  %s73_s12, 64, %s75_s15, [#allocation9]  }
  0x14   :  { %s4543_s2 = smov [#allocation13]   ;;  %s4544_s20 = smov 64  }
  0x15   :  { %s99_s19 = sshll.u32 %s4543_s2, 4  ;;  %s4545_s21 = smov 4   ;;  %s100_s19 = int_to_ptr.vmem [resolvable:$true] %s99_s19 }
  0x16   :  { %105 = dma.hbm_to_vmem [thread:$0]  %s98_s18, 4096, %s100_s19, [#allocation12], %s4544_s20, %s4544_s20, %s4545_s21  }
  0x17   :  { %4525 = dma.done.wait [#allocation3], 64  }
  0x18   :  { %4526 = vsyncadd [#allocation3], 4294967232 }
  0x19   :  { %4527 = dma.done.wait [#allocation6], 4160  }
  0x1a   :  { %4528 = vsyncadd [#allocation6], 4294963136 }
  0x1b   :  { %4529 = dma.done.wait [#allocation9], 16448  }
  0x1c   :  { %4530 = vsyncadd [#allocation9], 4294950848 }
  0x1d   :  { %4531 = dma.done.wait [#allocation12], 20480  }
  0x1e   :  { %4532 = vsyncadd [#allocation12], 4294946816  ;;  %v2834_v0 = vld [vmem:[#allocation5 + $0xe0] sm:$0xf]  ;;  %v4030_v1 = vld [vmem:[#allocation5 + $0xec] sm:$0xf0] }
  0x1f   :  { %v4028_v2 = vld [vmem:[#allocation5 + $0xe4] sm:$0xf]  ;;  %v2835_v3 = vor.u32 %v4030_v1, %v2834_v0  ;;  %v2836_v4 = vld [vmem:[#allocation5 + $0xf0] sm:$0xf0]  ;;  %v2842_v5 = vld [vmem:[#allocation5 + $0xe8] sm:$0xf] }
  0x20   :  { %v4031_v6 = vld [vmem:[#allocation5 + $0xf4] sm:$0xf0]  ;;  %v2839_v7 = vor.u32 %v4028_v2, %v2836_v4  ;;  %v4029_v9 = vld [vmem:[#allocation5 + $0xec] sm:$0xf]  ;;  %v2844_v10 = vld [vmem:[#allocation5 + $0xf8] sm:$0xf0] }
  0x21   :  { %v2843_v8 = vor.u32 %v4031_v6, %v2842_v5  ;;  %v2818_v11 = vld [vmem:[#allocation5 + $0xc0] sm:$0xf]  ;;  %339 = vmatpush.bf16.msra.mxu0 %v2835_v3  ;;  %v2847_v12 = vor.u32 %v4029_v9, %v2844_v10  ;;  %v4026_v13 = vld [vmem:[#allocation5 + $0xcc] sm:$0xf0]  ;;  %v4024_v14 = vld [vmem:[#allocation5 + $0xc4] sm:$0xf] }
  0x22   :  { %v2820_v15 = vld [vmem:[#allocation5 + $0xd0] sm:$0xf0]  ;;  %352 = vmatpush.bf16.msra.mxu1 %v2839_v7  ;;  %v2819_v16 = vor.u32 %v4026_v13, %v2818_v11  ;;  %v2826_v18 = vld [vmem:[#allocation5 + $0xc8] sm:$0xf]  ;;  %v4027_v19 = vld [vmem:[#allocation5 + $0xd4] sm:$0xf0] }
  0x23   :  { %365 = vmatpush.bf16.msra.mxu2 %v2843_v8  ;;  %v2823_v17 = vor.u32 %v4024_v14, %v2820_v15  ;;  %v4025_v20 = vld [vmem:[#allocation5 + $0xcc] sm:$0xf]  ;;  %378 = vmatpush.bf16.msra.mxu3 %v2847_v12  ;;  %v2827_v21 = vor.u32 %v4027_v19, %v2826_v18  ;;  %v2828_v22 = vld [vmem:[#allocation5 + $0xd8] sm:$0xf0]  ;;  %v2802_v23 = vld [vmem:[#allocation5 + $0xa0] sm:$0xf] }
  0x24   :  { %v4022_v24 = vld [vmem:[#allocation5 + $0xac] sm:$0xf0]  ;;  %v2831_v25 = vor.u32 %v4025_v20, %v2828_v22  ;;  %v4020_v26 = vld [vmem:[#allocation5 + $0xa4] sm:$0xf]  ;;  %v2804_v27 = vld [vmem:[#allocation5 + $0xb0] sm:$0xf0] }
  0x25   :  { %v2810_v28 = vld [vmem:[#allocation5 + $0xa8] sm:$0xf]  ;;  %340 = vmatpush.bf16.msra.mxu0 %v2819_v16  ;;  %v2803_v29 = vor.u32 %v4022_v24, %v2802_v23  ;;  %v4023_v30 = vld [vmem:[#allocation5 + $0xb4] sm:$0xf0]  ;;  %v4021_v31 = vld [vmem:[#allocation5 + $0xac] sm:$0xf]  ;;  %v2807_v33 = vor.u32 %v4020_v26, %v2804_v27 }
  0x26   :  { %v2812_v32 = vld [vmem:[#allocation5 + $0xb8] sm:$0xf0]  ;;  %353 = vmatpush.bf16.msra.mxu1 %v2823_v17  ;;  %v2811_v34 = vor.u32 %v4023_v30, %v2810_v28  ;;  %v2786_v35 = vld [vmem:[#allocation5 + $0x80] sm:$0xf]  ;;  %v4018_v36 = vld [vmem:[#allocation5 + $0x8c] sm:$0xf0] }
  0x27   :  { %366 = vmatpush.bf16.msra.mxu2 %v2827_v21  ;;  %v4016_v37 = vld [vmem:[#allocation5 + $0x84] sm:$0xf]  ;;  %379 = vmatpush.bf16.msra.mxu3 %v2831_v25  ;;  %v2815_v38 = vor.u32 %v4021_v31, %v2812_v32  ;;  %v2788_v39 = vld [vmem:[#allocation5 + $0x90] sm:$0xf0]  ;;  %v2794_v40 = vld [vmem:[#allocation5 + $0x88] sm:$0xf]  ;;  %v2787_v44 = vor.u32 %v4018_v36, %v2786_v35 }
  0x28   :  { %v4019_v41 = vld [vmem:[#allocation5 + $0x94] sm:$0xf0]  ;;  %v4017_v42 = vld [vmem:[#allocation5 + $0x8c] sm:$0xf]  ;;  %v2796_v43 = vld [vmem:[#allocation5 + $0x98] sm:$0xf0]  ;;  %v2791_v45 = vor.u32 %v4016_v37, %v2788_v39 }
  0x29   :  { %341 = vmatpush.bf16.msra.mxu0 %v2803_v29  ;;  %v2795_v46 = vor.u32 %v4019_v41, %v2794_v40  ;;  %v2770_v47 = vld [vmem:[#allocation5 + $0x60] sm:$0xf]  ;;  %v4014_v48 = vld [vmem:[#allocation5 + $0x6c] sm:$0xf0]  ;;  %v4012_v49 = vld [vmem:[#allocation5 + $0x64] sm:$0xf]  ;;  %v2799_v50 = vor.u32 %v4017_v42, %v2796_v43 }
  0x2a   :  { %354 = vmatpush.bf16.msra.mxu1 %v2807_v33  ;;  %v2772_v51 = vld [vmem:[#allocation5 + $0x70] sm:$0xf0]  ;;  %v2778_v52 = vld [vmem:[#allocation5 + $0x68] sm:$0xf]  ;;  %v4015_v53 = vld [vmem:[#allocation5 + $0x74] sm:$0xf0]  ;;  %v2771_v56 = vor.u32 %v4014_v48, %v2770_v47 }
  0x2b   :  { %367 = vmatpush.bf16.msra.mxu2 %v2811_v34  ;;  %380 = vmatpush.bf16.msra.mxu3 %v2815_v38  ;;  %v4013_v54 = vld [vmem:[#allocation5 + $0x6c] sm:$0xf]  ;;  %v2780_v55 = vld [vmem:[#allocation5 + $0x78] sm:$0xf0]  ;;  %v2775_v57 = vor.u32 %v4012_v49, %v2772_v51  ;;  %v2779_v58 = vor.u32 %v4015_v53, %v2778_v52  ;;  %v2754_v59 = vld [vmem:[#allocation5 + $0x40] sm:$0xf] }
  0x2c   :  { %v4010_v60 = vld [vmem:[#allocation5 + $0x4c] sm:$0xf0]  ;;  %v4008_v61 = vld [vmem:[#allocation5 + $0x44] sm:$0xf]  ;;  %v2783_v62 = vor.u32 %v4013_v54, %v2780_v55  ;;  %v2756_v63 = vld [vmem:[#allocation5 + $0x50] sm:$0xf0] }
  0x2d   :  { %342 = vmatpush.bf16.msra.mxu0 %v2787_v44  ;;  %v2762_v0 = vld [vmem:[#allocation5 + $0x48] sm:$0xf]  ;;  %v4011_v1 = vld [vmem:[#allocation5 + $0x54] sm:$0xf0]  ;;  %v4009_v2 = vld [vmem:[#allocation5 + $0x4c] sm:$0xf]  ;;  %v2755_v4 = vor.u32 %v4010_v60, %v2754_v59  ;;  %v2759_v5 = vor.u32 %v4008_v61, %v2756_v63 }
  0x2e   :  { %355 = vmatpush.bf16.msra.mxu1 %v2791_v45  ;;  %v2764_v3 = vld [vmem:[#allocation5 + $0x58] sm:$0xf0]  ;;  %v2763_v6 = vor.u32 %v4011_v1, %v2762_v0  ;;  %v2738_v7 = vld [vmem:[#allocation5 + $0x20] sm:$0xf]  ;;  %v4006_v8 = vld [vmem:[#allocation5 + $0x2c] sm:$0xf0] }
  0x2f   :  { %368 = vmatpush.bf16.msra.mxu2 %v2795_v46  ;;  %381 = vmatpush.bf16.msra.mxu3 %v2799_v50  ;;  %v4004_v9 = vld [vmem:[#allocation5 + $0x24] sm:$0xf]  ;;  %v2767_v10 = vor.u32 %v4009_v2, %v2764_v3  ;;  %v2740_v11 = vld [vmem:[#allocation5 + $0x30] sm:$0xf0]  ;;  %v2746_v12 = vld [vmem:[#allocation5 + $0x28] sm:$0xf]  ;;  %v2739_v16 = vor.u32 %v4006_v8, %v2738_v7 }
  0x30   :  { %v4007_v13 = vld [vmem:[#allocation5 + $0x34] sm:$0xf0]  ;;  %v4005_v14 = vld [vmem:[#allocation5 + $0x2c] sm:$0xf]  ;;  %v2748_v15 = vld [vmem:[#allocation5 + $0x38] sm:$0xf0]  ;;  %v2743_v18 = vor.u32 %v4004_v9, %v2740_v11 }
  0x31   :  { %343 = vmatpush.bf16.msra.mxu0 %v2771_v56  ;;  %v2722_v17 = vld [vmem:[#allocation5] sm:$0xf]  ;;  %v2747_v19 = vor.u32 %v4007_v13, %v2746_v12  ;;  %v4002_v20 = vld [vmem:[#allocation5 + $0xc] sm:$0xf0]  ;;  %v4000_v21 = vld [vmem:[#allocation5 + $0x4] sm:$0xf]  ;;  %v2751_v23 = vor.u32 %v4005_v14, %v2748_v15 }
  0x32   :  { %356 = vmatpush.bf16.msra.mxu1 %v2775_v57  ;;  %v2724_v22 = vld [vmem:[#allocation5 + $0x10] sm:$0xf0]  ;;  %v2730_v24 = vld [vmem:[#allocation5 + $0x8] sm:$0xf]  ;;  %v4003_v25 = vld [vmem:[#allocation5 + $0x14] sm:$0xf0]  ;;  %v2723_v30 = vor.u32 %v4002_v20, %v2722_v17 }
  0x33   :  { %369 = vmatpush.bf16.msra.mxu2 %v2779_v58  ;;  %382 = vmatpush.bf16.msra.mxu3 %v2783_v62  ;;  %v4001_v26 = vld [vmem:[#allocation5 + $0xc] sm:$0xf]  ;;  %v2732_v27 = vld [vmem:[#allocation5 + $0x18] sm:$0xf0]  ;;  %v2962_v28 = vld [vmem:[#allocation8 + $0xe0] sm:$0xf]  ;;  %v2727_v33 = vor.u32 %v4000_v21, %v2724_v22  ;;  %v2731_v34 = vor.u32 %v4003_v25, %v2730_v24 }
  0x34   :  { %v4062_v29 = vld [vmem:[#allocation8 + $0xec] sm:$0xf0]  ;;  %v3090_v31 = vld [vmem:[#allocation8 + $0x1e0] sm:$0xf]  ;;  %v2735_v35 = vor.u32 %v4001_v26, %v2732_v27  ;;  %v136_v44 = vld [vmem:[#allocation2] sm:$0xf] }
  0x35   :  { %344 = vmatpush.bf16.msra.mxu0 %v2755_v4  ;;  %v4094_v32 = vld [vmem:[#allocation8 + $0x1ec] sm:$0xf0]  ;;  %v2963_v36 = vor.u32 %v4062_v29, %v2962_v28  ;;  %v2946_v37 = vld [vmem:[#allocation8 + $0xc0] sm:$0xf]  ;;  %s4546_s23 = smov [#allocation14]   ;;  %s2707_s26 = sshll.u32 %s4708_s9, 4  ;;  %s2708_s26 = int_to_ptr.hbm [resolvable:$true] %s2707_s26 }
  0x36   :  { %357 = vmatpush.bf16.msra.mxu1 %v2759_v5  ;;  %v3218_v38 = vld [vmem:[#allocation8 + $0x2e0] sm:$0xf]  ;;  %v4126_v39 = vld [vmem:[#allocation8 + $0x2ec] sm:$0xf0]  ;;  %v3091_v40 = vor.u32 %v4094_v32, %v3090_v31  ;;  %s2705_s1 = sshll.u32 %s4546_s23, 4  ;;  %s2706_s1 = int_to_ptr.vmem [resolvable:$true] %s2705_s1 }
  0x37   :  { %370 = vmatpush.bf16.msra.mxu2 %v2763_v6  ;;  %383 = vmatpush.bf16.msra.mxu3 %v2767_v10  ;;  %v4058_v41 = vld [vmem:[#allocation8 + $0xcc] sm:$0xf0]  ;;  %v3346_v42 = vld [vmem:[#allocation8 + $0x3e0] sm:$0xf]  ;;  %v3219_v47 = vor.u32 %v4126_v39, %v3218_v38 }
  0x38   :  { %v4158_v43 = vld [vmem:[#allocation8 + $0x3ec] sm:$0xf0]  ;;  %v3074_v45 = vld [vmem:[#allocation8 + $0x1c0] sm:$0xf]  ;;  %v2947_v48 = vor.u32 %v4058_v41, %v2946_v37 }
  0x39   :  { %345 = vmatpush.bf16.msra.mxu0 %v2739_v16  ;;  %v4090_v46 = vld [vmem:[#allocation8 + $0x1cc] sm:$0xf0]  ;;  %v3347_v49 = vor.u32 %v4158_v43, %v3346_v42  ;;  %v2930_v50 = vld [vmem:[#allocation8 + $0xa0] sm:$0xf] }
  0x3a   :  { %358 = vmatpush.bf16.msra.mxu1 %v2743_v18  ;;  %v3202_v51 = vld [vmem:[#allocation8 + $0x2c0] sm:$0xf]  ;;  %v4122_v52 = vld [vmem:[#allocation8 + $0x2cc] sm:$0xf0]  ;;  %v3075_v53 = vor.u32 %v4090_v46, %v3074_v45 }
  0x3b   :  { %371 = vmatpush.bf16.msra.mxu2 %v2747_v19  ;;  %384 = vmatpush.bf16.msra.mxu3 %v2751_v23  ;;  %v4054_v54 = vld [vmem:[#allocation8 + $0xac] sm:$0xf0]  ;;  %v3330_v55 = vld [vmem:[#allocation8 + $0x3c0] sm:$0xf]  ;;  %v3203_v59 = vor.u32 %v4122_v52, %v3202_v51 }
  0x3c   :  { %v4154_v56 = vld [vmem:[#allocation8 + $0x3cc] sm:$0xf0]  ;;  %v3058_v57 = vld [vmem:[#allocation8 + $0x1a0] sm:$0xf]  ;;  %v2931_v60 = vor.u32 %v4054_v54, %v2930_v50 }
  0x3d   :  { %346 = vmatpush.bf16.msra.mxu0 %v2723_v30  ;;  %v4086_v58 = vld [vmem:[#allocation8 + $0x1ac] sm:$0xf0]  ;;  %v3331_v61 = vor.u32 %v4154_v56, %v3330_v55  ;;  %v2914_v62 = vld [vmem:[#allocation8 + $0x80] sm:$0xf]  ;;  %v4060_v55 = vld [vmem:[#allocation8 + $0xe4] sm:$0xf] }
  0x3e   :  { %359 = vmatpush.bf16.msra.mxu1 %v2727_v33  ;;  %v3186_v63 = vld [vmem:[#allocation8 + $0x2a0] sm:$0xf]  ;;  %v4118_v0 = vld [vmem:[#allocation8 + $0x2ac] sm:$0xf0]  ;;  %v3059_v1 = vor.u32 %v4086_v58, %v3058_v57  ;;  %v2964_v56 = vld [vmem:[#allocation8 + $0xf0] sm:$0xf0] }
  0x3f   :  { %372 = vmatpush.bf16.msra.mxu2 %v2731_v34  ;;  %385 = vmatpush.bf16.msra.mxu3 %v2735_v35  ;;  %v4050_v2 = vld [vmem:[#allocation8 + $0x8c] sm:$0xf0]  ;;  %v3314_v3 = vld [vmem:[#allocation8 + $0x3a0] sm:$0xf]  ;;  %v3187_v7 = vor.u32 %v4118_v0, %v3186_v63  ;;  %v4092_v57 = vld [vmem:[#allocation8 + $0x1e4] sm:$0xf] }
  0x40   :  { %347 = vmatmul.bf16.vlgmr.msra.gmra.mxu0 %v136_v44  ;;  %v4150_v4 = vld [vmem:[#allocation8 + $0x3ac] sm:$0xf0]  ;;  %v3042_v5 = vld [vmem:[#allocation8 + $0x180] sm:$0xf]  ;;  %v2915_v8 = vor.u32 %v4050_v2, %v2914_v62  ;;  %v3092_v58 = vld [vmem:[#allocation8 + $0x1f0] sm:$0xf0] }
  0x41   :  { %1177 = vmatpush.bf16.msrb.mxu0 %v2963_v36  ;;  %360 = vmatmul.bf16.vlgmr.msra.gmra.mxu1 %v136_v44  ;;  %v4082_v6 = vld [vmem:[#allocation8 + $0x18c] sm:$0xf0]  ;;  %v3315_v9 = vor.u32 %v4150_v4, %v3314_v3  ;;  %v2898_v10 = vld [vmem:[#allocation8 + $0x60] sm:$0xf]  ;;  %v4056_v62 = vld [vmem:[#allocation8 + $0xc4] sm:$0xf]  ;;  %v2967_v3 = vor.u32 %v4060_v55, %v2964_v56 }
  0x42   :  { %1190 = vmatpush.bf16.msrb.mxu1 %v3091_v40  ;;  %373 = vmatmul.bf16.vlgmr.msra.gmra.mxu2 %v136_v44  ;;  %v3170_v11 = vld [vmem:[#allocation8 + $0x280] sm:$0xf]  ;;  %v4114_v12 = vld [vmem:[#allocation8 + $0x28c] sm:$0xf0]  ;;  %v3043_v13 = vor.u32 %v4082_v6, %v3042_v5  ;;  %v4124_v5 = vld [vmem:[#allocation8 + $0x2e4] sm:$0xf] }
  0x43   :  { %386 = vmatmul.bf16.vlgmr.msra.gmra.mxu3 %v136_v44  ;;  %1203 = vmatpush.bf16.msrb.mxu2 %v3219_v47  ;;  %v4046_v14 = vld [vmem:[#allocation8 + $0x6c] sm:$0xf0]  ;;  %v3298_v15 = vld [vmem:[#allocation8 + $0x380] sm:$0xf]  ;;  %v3171_v19 = vor.u32 %v4114_v12, %v3170_v11  ;;  %v3220_v6 = vld [vmem:[#allocation8 + $0x2f0] sm:$0xf0] }
  0x44   :  { %1216 = vmatpush.bf16.msrb.mxu3 %v3347_v49  ;;  %v4146_v16 = vld [vmem:[#allocation8 + $0x38c] sm:$0xf0]  ;;  %v3026_v17 = vld [vmem:[#allocation8 + $0x160] sm:$0xf]  ;;  %v2899_v20 = vor.u32 %v4046_v14, %v2898_v10  ;;  %v3348_v10 = vld [vmem:[#allocation8 + $0x3f0] sm:$0xf0] }
  0x45   :  { %1178 = vmatpush.bf16.msrb.mxu0 %v2947_v48  ;;  %v4078_v18 = vld [vmem:[#allocation8 + $0x16c] sm:$0xf0]  ;;  %v3299_v21 = vor.u32 %v4146_v16, %v3298_v15  ;;  %v2882_v22 = vld [vmem:[#allocation8 + $0x40] sm:$0xf]  ;;  %v4088_v11 = vld [vmem:[#allocation8 + $0x1c4] sm:$0xf]  ;;  %v3223_v15 = vor.u32 %v4124_v5, %v3220_v6 }
  0x46   :  { %1191 = vmatpush.bf16.msrb.mxu1 %v3075_v53  ;;  %v3154_v23 = vld [vmem:[#allocation8 + $0x260] sm:$0xf]  ;;  %v4110_v24 = vld [vmem:[#allocation8 + $0x26c] sm:$0xf0]  ;;  %v3027_v25 = vor.u32 %v4078_v18, %v3026_v17  ;;  %v3076_v12 = vld [vmem:[#allocation8 + $0x1d0] sm:$0xf0] }
  0x47   :  { %1204 = vmatpush.bf16.msrb.mxu2 %v3203_v59  ;;  %v4042_v26 = vld [vmem:[#allocation8 + $0x4c] sm:$0xf0]  ;;  %v3282_v27 = vld [vmem:[#allocation8 + $0x360] sm:$0xf]  ;;  %v3155_v31 = vor.u32 %v4110_v24, %v3154_v23  ;;  %v4052_v18 = vld [vmem:[#allocation8 + $0xa4] sm:$0xf] }
  0x48   :  { %1217 = vmatpush.bf16.msrb.mxu3 %v3331_v61  ;;  %v4142_v28 = vld [vmem:[#allocation8 + $0x36c] sm:$0xf0]  ;;  %v3010_v29 = vld [vmem:[#allocation8 + $0x140] sm:$0xf]  ;;  %v2883_v32 = vor.u32 %v4042_v26, %v2882_v22  ;;  %v2932_v22 = vld [vmem:[#allocation8 + $0xb0] sm:$0xf0] }
  0x49   :  { %1179 = vmatpush.bf16.msrb.mxu0 %v2931_v60  ;;  %v4074_v30 = vld [vmem:[#allocation8 + $0x14c] sm:$0xf0]  ;;  %v3283_v33 = vor.u32 %v4142_v28, %v3282_v27  ;;  %v2866_v34 = vld [vmem:[#allocation8 + $0x20] sm:$0xf]  ;;  %v4152_v23 = vld [vmem:[#allocation8 + $0x3c4] sm:$0xf]  ;;  %v2935_v28 = vor.u32 %v4052_v18, %v2932_v22 }
  0x4a   :  { %1192 = vmatpush.bf16.msrb.mxu1 %v3059_v1  ;;  %v3138_v35 = vld [vmem:[#allocation8 + $0x240] sm:$0xf]  ;;  %v4106_v36 = vld [vmem:[#allocation8 + $0x24c] sm:$0xf0]  ;;  %v3011_v37 = vor.u32 %v4074_v30, %v3010_v29  ;;  %v3332_v24 = vld [vmem:[#allocation8 + $0x3d0] sm:$0xf0] }
  0x4b   :  { %1205 = vmatpush.bf16.msrb.mxu2 %v3187_v7  ;;  %v4038_v38 = vld [vmem:[#allocation8 + $0x2c] sm:$0xf0]  ;;  %v3266_v39 = vld [vmem:[#allocation8 + $0x340] sm:$0xf]  ;;  %v3139_v43 = vor.u32 %v4106_v36, %v3138_v35  ;;  %v3095_v7 = vor.u32 %v4092_v57, %v3092_v58  ;;  %v3060_v26 = vld [vmem:[#allocation8 + $0x1b0] sm:$0xf0]  ;;  %v3335_v29 = vor.u32 %v4152_v23, %v3332_v24 }
  0x4c   :  { %1218 = vmatpush.bf16.msrb.mxu3 %v3315_v9  ;;  %v4138_v40 = vld [vmem:[#allocation8 + $0x34c] sm:$0xf0]  ;;  %v2994_v41 = vld [vmem:[#allocation8 + $0x120] sm:$0xf]  ;;  %v2867_v45 = vor.u32 %v4038_v38, %v2866_v34  ;;  %v4156_v9 = vld [vmem:[#allocation8 + $0x3e4] sm:$0xf] }
  0x4d   :  { %1180 = vmatpush.bf16.msrb.mxu0 %v2915_v8  ;;  %v4070_v42 = vld [vmem:[#allocation8 + $0x12c] sm:$0xf0]  ;;  %v2850_v44 = vld [vmem:[#allocation8] sm:$0xf]  ;;  %v3267_v46 = vor.u32 %v4138_v40, %v3266_v39  ;;  %v2948_v8 = vld [vmem:[#allocation8 + $0xd0] sm:$0xf0]  ;;  %v3351_v17 = vor.u32 %v4156_v9, %v3348_v10 }
  0x4e   :  { %1193 = vmatpush.bf16.msrb.mxu1 %v3043_v13  ;;  %v4034_v47 = vld [vmem:[#allocation8 + $0xc] sm:$0xf0]  ;;  %v3122_v48 = vld [vmem:[#allocation8 + $0x220] sm:$0xf]  ;;  %v2995_v50 = vor.u32 %v4070_v42, %v2994_v41  ;;  %v2951_v16 = vor.u32 %v4056_v62, %v2948_v8  ;;  %v4048_v30 = vld [vmem:[#allocation8 + $0x84] sm:$0xf] }
  0x4f   :  { %1206 = vmatpush.bf16.msrb.mxu2 %v3171_v19  ;;  %v4102_v49 = vld [vmem:[#allocation8 + $0x22c] sm:$0xf0]  ;;  %v2978_v51 = vld [vmem:[#allocation8 + $0x100] sm:$0xf]  ;;  %v2851_v60 = vor.u32 %v4034_v47, %v2850_v44  ;;  %v4120_v19 = vld [vmem:[#allocation8 + $0x2c4] sm:$0xf] }
  0x50   :  { %1219 = vmatpush.bf16.msrb.mxu3 %v3299_v21  ;;  %v3250_v52 = vld [vmem:[#allocation8 + $0x320] sm:$0xf]  ;;  %v4134_v53 = vld [vmem:[#allocation8 + $0x32c] sm:$0xf0]  ;;  %v3123_v59 = vor.u32 %v4102_v49, %v3122_v48  ;;  %v3079_v21 = vor.u32 %v4088_v11, %v3076_v12  ;;  %v2916_v34 = vld [vmem:[#allocation8 + $0x90] sm:$0xf0] }
  0x51   :  { %1181 = vmatpush.bf16.msrb.mxu0 %v2899_v20  ;;  %v4066_v54 = vld [vmem:[#allocation8 + $0x10c] sm:$0xf0]  ;;  %v3251_v61 = vor.u32 %v4134_v53, %v3250_v52  ;;  %v3106_v63 = vld [vmem:[#allocation8 + $0x200] sm:$0xf]  ;;  %v3204_v20 = vld [vmem:[#allocation8 + $0x2d0] sm:$0xf0]  ;;  %v2919_v40 = vor.u32 %v4048_v30, %v2916_v34 }
  0x52   :  { %1194 = vmatpush.bf16.msrb.mxu1 %v3027_v25  ;;  %v4098_v0 = vld [vmem:[#allocation8 + $0x20c] sm:$0xf0]  ;;  %v3234_v1 = vld [vmem:[#allocation8 + $0x300] sm:$0xf]  ;;  %v2979_v2 = vor.u32 %v4066_v54, %v2978_v51  ;;  %v4084_v25 = vld [vmem:[#allocation8 + $0x1a4] sm:$0xf]  ;;  %v3207_v27 = vor.u32 %v4120_v19, %v3204_v20 }
  0x53   :  { %1207 = vmatpush.bf16.msrb.mxu2 %v3155_v31  ;;  %v4130_v4 = vld [vmem:[#allocation8 + $0x30c] sm:$0xf0]  ;;  %v3107_v13 = vor.u32 %v4098_v0, %v3106_v63  ;;  %v4116_v31 = vld [vmem:[#allocation8 + $0x2a4] sm:$0xf]  ;;  %v3316_v36 = vld [vmem:[#allocation8 + $0x3b0] sm:$0xf0] }
  0x54   :  { %1220 = vmatpush.bf16.msrb.mxu3 %v3283_v33  ;;  %v3235_v14 = vor.u32 %v4130_v4, %v3234_v1  ;;  %v3063_v33 = vor.u32 %v4084_v25, %v3060_v26  ;;  %v4148_v35 = vld [vmem:[#allocation8 + $0x3a4] sm:$0xf]  ;;  %v3044_v38 = vld [vmem:[#allocation8 + $0x190] sm:$0xf0] }
  0x55   :  { %1182 = vmatpush.bf16.msrb.mxu0 %v2883_v32  ;;  %v3188_v32 = vld [vmem:[#allocation8 + $0x2b0] sm:$0xf0]  ;;  %v3319_v41 = vor.u32 %v4148_v35, %v3316_v36  ;;  %v4044_v42 = vld [vmem:[#allocation8 + $0x64] sm:$0xf] }
  0x56   :  { %1195 = vmatpush.bf16.msrb.mxu1 %v3011_v37  ;;  %v4080_v37 = vld [vmem:[#allocation8 + $0x184] sm:$0xf]  ;;  %v3191_v39 = vor.u32 %v4116_v31, %v3188_v32  ;;  %v3172_v44 = vld [vmem:[#allocation8 + $0x290] sm:$0xf0] }
  0x57   :  { %1208 = vmatpush.bf16.msrb.mxu2 %v3139_v43  ;;  %v4112_v43 = vld [vmem:[#allocation8 + $0x284] sm:$0xf]  ;;  %v3300_v48 = vld [vmem:[#allocation8 + $0x390] sm:$0xf0] }
  0x58   :  { %1221 = vmatpush.bf16.msrb.mxu3 %v3267_v46  ;;  %v2900_v46 = vld [vmem:[#allocation8 + $0x70] sm:$0xf0]  ;;  %v4144_v47 = vld [vmem:[#allocation8 + $0x384] sm:$0xf]  ;;  %v3175_v51 = vor.u32 %v4112_v43, %v3172_v44  ;;  %v4095_v43 = vld [vmem:[#allocation8 + $0x1f4] sm:$0xf0] }
  0x59   :  { %1183 = vmatpush.bf16.msrb.mxu0 %v2867_v45  ;;  %v3047_v45 = vor.u32 %v4080_v37, %v3044_v38  ;;  %v4076_v49 = vld [vmem:[#allocation8 + $0x164] sm:$0xf]  ;;  %v2903_v52 = vor.u32 %v4044_v42, %v2900_v46  ;;  %v3303_v53 = vor.u32 %v4144_v47, %v3300_v48  ;;  %v2884_v56 = vld [vmem:[#allocation8 + $0x50] sm:$0xf0]  ;;  %v3098_v42 = vld [vmem:[#allocation8 + $0x1e8] sm:$0xf] }
  0x5a   :  { %1196 = vmatpush.bf16.msrb.mxu1 %v2995_v50  ;;  %v3028_v50 = vld [vmem:[#allocation8 + $0x170] sm:$0xf0]  ;;  %v4040_v55 = vld [vmem:[#allocation8 + $0x44] sm:$0xf] }
  0x5b   :  { %1209 = vmatpush.bf16.msrb.mxu2 %v3123_v59  ;;  %v3031_v54 = vor.u32 %v4076_v49, %v3028_v50  ;;  %v4072_v57 = vld [vmem:[#allocation8 + $0x144] sm:$0xf]  ;;  %v3012_v58 = vld [vmem:[#allocation8 + $0x150] sm:$0xf0]  ;;  %v2887_v59 = vor.u32 %v4040_v55, %v2884_v56  ;;  %v3099_v50 = vor.u32 %v4095_v43, %v3098_v42  ;;  %v4091_v55 = vld [vmem:[#allocation8 + $0x1d4] sm:$0xf0] }
  0x5c   :  { %1222 = vmatpush.bf16.msrb.mxu3 %v3251_v61  ;;  %v4108_v61 = vld [vmem:[#allocation8 + $0x264] sm:$0xf]  ;;  %v3156_v62 = vld [vmem:[#allocation8 + $0x270] sm:$0xf0] }
  0x5d   :  { %1184 = vmatpush.bf16.msrb.mxu0 %v2851_v60  ;;  %v3015_v60 = vor.u32 %v4072_v57, %v3012_v58  ;;  %v4140_v63 = vld [vmem:[#allocation8 + $0x364] sm:$0xf]  ;;  %v3159_v0 = vor.u32 %v4108_v61, %v3156_v62  ;;  %v3284_v1 = vld [vmem:[#allocation8 + $0x370] sm:$0xf0]  ;;  %v3226_v61 = vld [vmem:[#allocation8 + $0x2e8] sm:$0xf] }
  0x5e   :  { %1197 = vmatpush.bf16.msrb.mxu1 %v2979_v2  ;;  %v3287_v2 = vor.u32 %v4140_v63, %v3284_v1  ;;  %v2868_v4 = vld [vmem:[#allocation8 + $0x30] sm:$0xf0]  ;;  %v4068_v6 = vld [vmem:[#allocation8 + $0x124] sm:$0xf]  ;;  %v4127_v62 = vld [vmem:[#allocation8 + $0x2f4] sm:$0xf0] }
  0x5f   :  { %1210 = vmatpush.bf16.msrb.mxu2 %v3107_v13  ;;  %v4104_v9 = vld [vmem:[#allocation8 + $0x244] sm:$0xf]  ;;  %v3140_v10 = vld [vmem:[#allocation8 + $0x250] sm:$0xf0]  ;;  %v3354_v63 = vld [vmem:[#allocation8 + $0x3e8] sm:$0xf] }
  0x60   :  { %1223 = vmatpush.bf16.msrb.mxu3 %v3235_v14  ;;  %v4136_v11 = vld [vmem:[#allocation8 + $0x344] sm:$0xf]  ;;  %v3143_v12 = vor.u32 %v4104_v9, %v3140_v10  ;;  %v3268_v13 = vld [vmem:[#allocation8 + $0x350] sm:$0xf0]  ;;  %v3227_v10 = vor.u32 %v4127_v62, %v3226_v61  ;;  %v4039_v61 = vld [vmem:[#allocation8 + $0x34] sm:$0xf0] }
  0x61   :  { %1229 = vmatpush.bf16.msra.mxu0 %v2967_v3  ;;  %v4036_v3 = vld [vmem:[#allocation8 + $0x24] sm:$0xf]  ;;  %v3271_v14 = vor.u32 %v4136_v11, %v3268_v13  ;;  %v2980_v19 = vld [vmem:[#allocation8 + $0x110] sm:$0xf0]  ;;  %v3002_v62 = vld [vmem:[#allocation8 + $0x128] sm:$0xf] }
  0x62   :  { %1242 = vmatpush.bf16.msra.mxu1 %v3095_v7  ;;  %v2871_v5 = vor.u32 %v4036_v3, %v2868_v4  ;;  %v2996_v7 = vld [vmem:[#allocation8 + $0x130] sm:$0xf0]  ;;  %v4132_v24 = vld [vmem:[#allocation8 + $0x324] sm:$0xf]  ;;  %v4159_v3 = vld [vmem:[#allocation8 + $0x3f4] sm:$0xf0] }
  0x63   :  { %1255 = vmatpush.bf16.msra.mxu2 %v3223_v15  ;;  %v2999_v8 = vor.u32 %v4068_v6, %v2996_v7  ;;  %v4032_v15 = vld [vmem:[#allocation8 + $0x4] sm:$0xf]  ;;  %v3124_v22 = vld [vmem:[#allocation8 + $0x230] sm:$0xf0]  ;;  %v2938_v4 = vld [vmem:[#allocation8 + $0xa8] sm:$0xf] }
  0x64   :  { %1268 = vmatpush.bf16.msra.mxu3 %v3351_v17  ;;  %v4064_v17 = vld [vmem:[#allocation8 + $0x104] sm:$0xf]  ;;  %v3252_v25 = vld [vmem:[#allocation8 + $0x330] sm:$0xf0]  ;;  %v3066_v7 = vld [vmem:[#allocation8 + $0x1a8] sm:$0xf] }
  0x65   :  { %1230 = vmatpush.bf16.msra.mxu0 %v2951_v16  ;;  %v2852_v16 = vld [vmem:[#allocation8 + $0x10] sm:$0xf0]  ;;  %v2983_v20 = vor.u32 %v4064_v17, %v2980_v19  ;;  %v3255_v26 = vor.u32 %v4132_v24, %v3252_v25  ;;  %v4128_v30 = vld [vmem:[#allocation8 + $0x304] sm:$0xf]  ;;  %v4155_v19 = vld [vmem:[#allocation8 + $0x3d4] sm:$0xf0] }
  0x66   :  { %1243 = vmatpush.bf16.msra.mxu1 %v3079_v21  ;;  %v2855_v18 = vor.u32 %v4032_v15, %v2852_v16  ;;  %v4100_v21 = vld [vmem:[#allocation8 + $0x224] sm:$0xf]  ;;  %v3236_v31 = vld [vmem:[#allocation8 + $0x310] sm:$0xf0]  ;;  %v4123_v15 = vld [vmem:[#allocation8 + $0x2d4] sm:$0xf0] }
  0x67   :  { %1256 = vmatpush.bf16.msra.mxu2 %v3207_v27  ;;  %v3127_v23 = vor.u32 %v4100_v21, %v3124_v22  ;;  %v4096_v27 = vld [vmem:[#allocation8 + $0x204] sm:$0xf]  ;;  %v3239_v32 = vor.u32 %v4128_v30, %v3236_v31  ;;  %v3338_v16 = vld [vmem:[#allocation8 + $0x3c8] sm:$0xf]  ;;  %v4051_v21 = vld [vmem:[#allocation8 + $0x94] sm:$0xf0] }
  0x68   :  { %1269 = vmatpush.bf16.msra.mxu3 %v3335_v29  ;;  %v3050_v22 = vld [vmem:[#allocation8 + $0x188] sm:$0xf]  ;;  %v4119_v30 = vld [vmem:[#allocation8 + $0x2b4] sm:$0xf0] }
  0x69   :  { %1231 = vmatpush.bf16.msra.mxu0 %v2935_v28  ;;  %v3108_v28 = vld [vmem:[#allocation8 + $0x210] sm:$0xf0] }
  0x6a   :  { %1244 = vmatpush.bf16.msra.mxu1 %v3063_v33  ;;  %v3111_v29 = vor.u32 %v4096_v27, %v3108_v28  ;;  %v169_v33 = vld [vmem:[#allocation7] sm:$0xf]  ;;  %v3339_v27 = vor.u32 %v4155_v19, %v3338_v16  ;;  %v4093_v16 = vld [vmem:[#allocation8 + $0x1ec] sm:$0xf] }
  0x6b   :  { %1257 = vmatpush.bf16.msra.mxu2 %v3191_v39  ;;  %v171_v34 = vperm.slane %v169_v33, 0  ;;  %v172_v35 = vperm.slane %v169_v33, 1  ;;  %v2970_v39 = vld [vmem:[#allocation8 + $0xe8] sm:$0xf]  ;;  %v173_v46 = vperm.slane %v169_v33, 2  ;;  %v174_v49 = vperm.slane %v169_v33, 3 }
  0x6c   :  { %1270 = vmatpush.bf16.msra.mxu3 %v3319_v41  ;;  %v4151_v33 = vld [vmem:[#allocation8 + $0x3b4] sm:$0xf0] }
  0x6d   :  { %1232 = vmatpush.bf16.msra.mxu0 %v2919_v40  ;;  %v4063_v40 = vld [vmem:[#allocation8 + $0xf4] sm:$0xf0] }
  0x6e   :  { %1245 = vmatpush.bf16.msra.mxu1 %v3047_v45  ;;  %v2971_v47 = vor.u32 %v4063_v40, %v2970_v39  ;;  %v3178_v40 = vld [vmem:[#allocation8 + $0x288] sm:$0xf] }
  0x6f   :  { %1258 = vmatpush.bf16.msra.mxu2 %v3175_v51  ;;  %v2954_v51 = vld [vmem:[#allocation8 + $0xc8] sm:$0xf] }
  0x70   :  { %1271 = vmatpush.bf16.msra.mxu3 %v3303_v53 }
  0x71   :  { %1233 = vmatpush.bf16.msra.mxu0 %v2903_v52  ;;  %v4059_v52 = vld [vmem:[#allocation8 + $0xd4] sm:$0xf0] }
  0x72   :  { %1246 = vmatpush.bf16.msra.mxu1 %v3031_v54  ;;  %v3082_v54 = vld [vmem:[#allocation8 + $0x1c8] sm:$0xf] }
  0x73   :  { %1259 = vmatpush.bf16.msra.mxu2 %v3159_v0 }
  0x74   :  { %1272 = vmatpush.bf16.msra.mxu3 %v3287_v2  ;;  %v3083_v2 = vor.u32 %v4091_v55, %v3082_v54  ;;  %v3162_v54 = vld [vmem:[#allocation8 + $0x268] sm:$0xf]  ;;  %v4111_v55 = vld [vmem:[#allocation8 + $0x274] sm:$0xf0] }
  0x75   :  { %1234 = vmatpush.bf16.msra.mxu0 %v2887_v59 }
  0x76   :  { %1247 = vmatpush.bf16.msra.mxu1 %v3015_v60  ;;  %v2955_v60 = vor.u32 %v4059_v52, %v2954_v51 }
  0x77   :  { %1260 = vmatpush.bf16.msra.mxu2 %v3143_v12  ;;  %v3355_v12 = vor.u32 %v4159_v3, %v3354_v63  ;;  %v4071_v63 = vld [vmem:[#allocation8 + $0x134] sm:$0xf0] }
  0x78   :  { %1273 = vmatpush.bf16.msra.mxu3 %v3271_v14  ;;  %v3210_v14 = vld [vmem:[#allocation8 + $0x2c8] sm:$0xf]  ;;  %v4107_v3 = vld [vmem:[#allocation8 + $0x254] sm:$0xf0] }
  0x79   :  { %1235 = vmatpush.bf16.msra.mxu0 %v2871_v5  ;;  %v4055_v5 = vld [vmem:[#allocation8 + $0xb4] sm:$0xf0]  ;;  %v3211_v25 = vor.u32 %v4123_v15, %v3210_v14  ;;  %v2972_v15 = vld [vmem:[#allocation8 + $0xf8] sm:$0xf0] }
  0x7a   :  { %1248 = vmatpush.bf16.msra.mxu1 %v2999_v8  ;;  %v4087_v8 = vld [vmem:[#allocation8 + $0x1b4] sm:$0xf0]  ;;  %v2939_v13 = vor.u32 %v4055_v5, %v2938_v4  ;;  %v3274_v4 = vld [vmem:[#allocation8 + $0x348] sm:$0xf] }
  0x7b   :  { %1261 = vmatpush.bf16.msra.mxu2 %v3127_v23  ;;  %v4083_v23 = vld [vmem:[#allocation8 + $0x194] sm:$0xf0] }
  0x7c   :  { %1274 = vmatpush.bf16.msra.mxu3 %v3255_v26  ;;  %v3051_v31 = vor.u32 %v4083_v23, %v3050_v22 }
  0x7d   :  { %1236 = vmatpush.bf16.msra.mxu0 %v2855_v18  ;;  %v3067_v18 = vor.u32 %v4087_v8, %v3066_v7  ;;  %v4139_v7 = vld [vmem:[#allocation8 + $0x354] sm:$0xf0]  ;;  %v2858_v8 = vld [vmem:[#allocation8 + $0x8] sm:$0xf] }
  0x7e   :  { %1249 = vmatpush.bf16.msra.mxu1 %v2983_v20  ;;  %v2922_v20 = vld [vmem:[#allocation8 + $0x88] sm:$0xf]  ;;  %v3275_v19 = vor.u32 %v4139_v7, %v3274_v4  ;;  %v3324_v7 = vld [vmem:[#allocation8 + $0x3b8] sm:$0xf0] }
  0x7f   :  { %1262 = vmatpush.bf16.msra.mxu2 %v3111_v29  ;;  %v2923_v28 = vor.u32 %v4051_v21, %v2922_v20  ;;  %v3194_v29 = vld [vmem:[#allocation8 + $0x2a8] sm:$0xf]  ;;  %v4103_v21 = vld [vmem:[#allocation8 + $0x234] sm:$0xf0] }
  0x80   :  { %1275 = vmatpush.bf16.msra.mxu3 %v3239_v32  ;;  %v3322_v32 = vld [vmem:[#allocation8 + $0x3a8] sm:$0xf] }
  0x81   :  { %v3323_v39 = vor.u32 %v4151_v33, %v3322_v32  ;;  %v3130_v20 = vld [vmem:[#allocation8 + $0x228] sm:$0xf]  ;;  %v3084_v32 = vld [vmem:[#allocation8 + $0x1d8] sm:$0xf0] }
  0xbd   :  { %v348_v36 = vpop.f32.mrf.mxu0 }
  0xbe   :  { %v349_v37 = vadd.f32 %v348_v36, %v171_v34  ;;  %v361_v38 = vpop.f32.mrf.mxu1  ;;  %v2906_v34 = vld [vmem:[#allocation8 + $0x68] sm:$0xf] }
  0xbf   :  { %v362_v41 = vadd.f32 %v361_v38, %v172_v35  ;;  %v4047_v35 = vld [vmem:[#allocation8 + $0x74] sm:$0xf0]  ;;  %v3034_v36 = vld [vmem:[#allocation8 + $0x168] sm:$0xf]  ;;  %v3195_v38 = vor.u32 %v4119_v30, %v3194_v29  ;;  %v3131_v29 = vor.u32 %v4103_v21, %v3130_v20  ;;  %v2956_v30 = vld [vmem:[#allocation8 + $0xd8] sm:$0xf0] }
  0xc0   :  { %v391_v44 = vmax.f32 %v349_v37, 0.0  ;;  %v4079_v37 = vld [vmem:[#allocation8 + $0x174] sm:$0xf0]  ;;  %v2907_v42 = vor.u32 %v4047_v35, %v2906_v34  ;;  %v3114_v34 = vld [vmem:[#allocation8 + $0x208] sm:$0xf] }
  0xc1   :  { %v392_v45 = vmax.f32 %v362_v41, 0.0  ;;  %v4115_v41 = vld [vmem:[#allocation8 + $0x294] sm:$0xf0]  ;;  %v3035_v43 = vor.u32 %v4079_v37, %v3034_v36  ;;  %v3242_v36 = vld [vmem:[#allocation8 + $0x308] sm:$0xf] }
  0xc2   :  { %v4618_v48 = vpack.c.bf16 %v391_v44, %v391_v44  ;;  %v3306_v44 = vld [vmem:[#allocation8 + $0x388] sm:$0xf]  ;;  %v3179_v51 = vor.u32 %v4115_v41, %v3178_v40  ;;  %v4099_v35 = vld [vmem:[#allocation8 + $0x214] sm:$0xf0]  ;;  %v4145_v20 = vld [vmem:[#allocation8 + $0x38c] sm:$0xf] }
  0xc3   :  { %v4620_v53 = vpack.c.bf16 %v392_v45, %v392_v45  ;;  %v4147_v45 = vld [vmem:[#allocation8 + $0x394] sm:$0xf0]  ;;  %v3308_v21 = vld [vmem:[#allocation8 + $0x398] sm:$0xf0] }
  0xc4   :  { %1185 = vmatmul.bf16.vlgmr.msrb.gmra.mxu0 %v4618_v48  ;;  %v3307_v52 = vor.u32 %v4147_v45, %v3306_v44  ;;  %v4131_v37 = vld [vmem:[#allocation8 + $0x314] sm:$0xf0]  ;;  %v4053_v44 = vld [vmem:[#allocation8 + $0xac] sm:$0xf]  ;;  %v3115_v45 = vor.u32 %v4099_v35, %v3114_v34  ;;  %v2876_v35 = vld [vmem:[#allocation8 + $0x38] sm:$0xf0] }
  0xc5   :  { %v374_v56 = vpop.f32.mrf.mxu2  ;;  %1198 = vmatmul.bf16.vlgmr.msrb.gmra.mxu1 %v4620_v53  ;;  %1281 = vmatpush.bf16.msrb.mxu0 %v2971_v47  ;;  %v350_v59 = vpop.f32.mrf.mxu0  ;;  %v4043_v47 = vld [vmem:[#allocation8 + $0x54] sm:$0xf0]  ;;  %v4037_v34 = vld [vmem:[#allocation8 + $0x2c] sm:$0xf] }
  0xc6   :  { %v375_v57 = vadd.f32 %v374_v56, %v173_v46  ;;  %v387_v58 = vpop.f32.mrf.mxu3  ;;  %1294 = vmatpush.bf16.msrb.mxu1 %v3099_v50  ;;  %v363_v1 = vpop.f32.mrf.mxu1  ;;  %v2890_v46 = vld [vmem:[#allocation8 + $0x48] sm:$0xf]  ;;  %v4075_v50 = vld [vmem:[#allocation8 + $0x154] sm:$0xf0] }
  0xc7   :  { %v388_v0 = vadd.f32 %v387_v58, %v174_v49  ;;  %v3018_v49 = vld [vmem:[#allocation8 + $0x148] sm:$0xf]  ;;  %v2891_v56 = vor.u32 %v4043_v47, %v2890_v46  ;;  %v4143_v59 = vld [vmem:[#allocation8 + $0x374] sm:$0xf0]  ;;  %v2940_v46 = vld [vmem:[#allocation8 + $0xb8] sm:$0xf0] }
  0xc8   :  { %v393_v6 = vmax.f32 %v375_v57, 0.0  ;;  %v3019_v57 = vor.u32 %v4075_v50, %v3018_v49  ;;  %v3290_v58 = vld [vmem:[#allocation8 + $0x368] sm:$0xf]  ;;  %v4085_v47 = vld [vmem:[#allocation8 + $0x1ac] sm:$0xf]  ;;  %v3243_v50 = vor.u32 %v4131_v37, %v3242_v36 }
  0xc9   :  { %v394_v9 = vmax.f32 %v388_v0, 0.0  ;;  %1282 = vmatpush.bf16.msrb.mxu0 %v2955_v60  ;;  %v2874_v60 = vld [vmem:[#allocation8 + $0x28] sm:$0xf]  ;;  %v3163_v0 = vor.u32 %v4111_v55, %v3162_v54  ;;  %v3291_v1 = vor.u32 %v4143_v59, %v3290_v58  ;;  %v3068_v49 = vld [vmem:[#allocation8 + $0x1b8] sm:$0xf0] }
  0xca   :  { %v4624_v11 = vpack.c.bf16 %v393_v6, %v393_v6  ;;  %1295 = vmatpush.bf16.msrb.mxu1 %v3083_v2  ;;  %v3146_v2 = vld [vmem:[#allocation8 + $0x248] sm:$0xf]  ;;  %v2875_v5 = vor.u32 %v4039_v61, %v2874_v60  ;;  %v3003_v6 = vor.u32 %v4071_v63, %v3002_v62  ;;  %v4121_v54 = vld [vmem:[#allocation8 + $0x2cc] sm:$0xf]  ;;  %v3212_v55 = vld [vmem:[#allocation8 + $0x2d8] sm:$0xf0] }
  0xcb   :  { %v4626_v17 = vpack.c.bf16 %v394_v9, %v394_v9  ;;  %v4035_v9 = vld [vmem:[#allocation8 + $0x14] sm:$0xf0]  ;;  %v3147_v14 = vor.u32 %v4107_v3, %v3146_v2  ;;  %v4153_v58 = vld [vmem:[#allocation8 + $0x3cc] sm:$0xf]  ;;  %v3340_v59 = vld [vmem:[#allocation8 + $0x3d8] sm:$0xf0] }
  0xcc   :  { %1211 = vmatmul.bf16.vlgmr.msrb.gmra.mxu2 %v4624_v11  ;;  %v2859_v22 = vor.u32 %v4035_v9, %v2858_v8  ;;  %v4049_v60 = vld [vmem:[#allocation8 + $0x8c] sm:$0xf]  ;;  %v2924_v61 = vld [vmem:[#allocation8 + $0x98] sm:$0xf0] }
  0xcd   :  { %1224 = vmatmul.bf16.vlgmr.msrb.gmra.mxu3 %v4626_v17  ;;  %1307 = vmatpush.bf16.msrb.mxu2 %v3227_v10  ;;  %v376_v24 = vpop.f32.mrf.mxu2  ;;  %v2986_v10 = vld [vmem:[#allocation8 + $0x108] sm:$0xf]  ;;  %v4081_v62 = vld [vmem:[#allocation8 + $0x18c] sm:$0xf]  ;;  %v3052_v63 = vld [vmem:[#allocation8 + $0x198] sm:$0xf0]  ;;  %v2927_v4 = vor.u32 %v4049_v60, %v2924_v61 }
  0xce   :  { %1320 = vmatpush.bf16.msrb.mxu3 %v3355_v12  ;;  %v389_v26 = vpop.f32.mrf.mxu3  ;;  %1283 = vmatpush.bf16.msrb.mxu0 %v2939_v13  ;;  %v4067_v12 = vld [vmem:[#allocation8 + $0x114] sm:$0xf0]  ;;  %v4061_v13 = vld [vmem:[#allocation8 + $0xec] sm:$0xf]  ;;  %v3258_v24 = vld [vmem:[#allocation8 + $0x328] sm:$0xf] }
  0xcf   :  { %1296 = vmatpush.bf16.msrb.mxu1 %v3067_v18  ;;  %v3100_v18 = vld [vmem:[#allocation8 + $0x1f8] sm:$0xf0]  ;;  %v2987_v23 = vor.u32 %v4067_v12, %v2986_v10  ;;  %v2975_v26 = vor.u32 %v4061_v13, %v2972_v15  ;;  %v4117_v2 = vld [vmem:[#allocation8 + $0x2ac] sm:$0xf] }
  0xd0   :  { %v3196_v3 = vld [vmem:[#allocation8 + $0x2b8] sm:$0xf0]  ;;  %v4045_v8 = vld [vmem:[#allocation8 + $0x6c] sm:$0xf] }
  0xd1   :  { %1308 = vmatpush.bf16.msrb.mxu2 %v3211_v25  ;;  %v4135_v25 = vld [vmem:[#allocation8 + $0x334] sm:$0xf0]  ;;  %v2908_v9 = vld [vmem:[#allocation8 + $0x78] sm:$0xf0]  ;;  %v4077_v10 = vld [vmem:[#allocation8 + $0x16c] sm:$0xf]  ;;  %v3199_v13 = vor.u32 %v4117_v2, %v3196_v3 }
  0xd2   :  { %1321 = vmatpush.bf16.msrb.mxu3 %v3339_v27  ;;  %1284 = vmatpush.bf16.msrb.mxu0 %v2923_v28  ;;  %v3103_v27 = vor.u32 %v4093_v16, %v3100_v18  ;;  %v4057_v28 = vld [vmem:[#allocation8 + $0xcc] sm:$0xf]  ;;  %v3259_v33 = vor.u32 %v4135_v25, %v3258_v24  ;;  %v3036_v12 = vld [vmem:[#allocation8 + $0x178] sm:$0xf0]  ;;  %v2911_v18 = vor.u32 %v4045_v8, %v2908_v9 }
  0xd3   :  { %1297 = vmatpush.bf16.msrb.mxu1 %v3051_v31  ;;  %v4089_v31 = vld [vmem:[#allocation8 + $0x1cc] sm:$0xf]  ;;  %v2959_v40 = vor.u32 %v4057_v28, %v2956_v30  ;;  %v3180_v16 = vld [vmem:[#allocation8 + $0x298] sm:$0xf0] }
  0xd4   :  { %1237 = vmatmul.bf16.vlgmr.msra.gmra.mxu0 %v4618_v48  ;;  %v3087_v41 = vor.u32 %v4089_v31, %v3084_v32  ;;  %v4113_v15 = vld [vmem:[#allocation8 + $0x28c] sm:$0xf]  ;;  %v3020_v25 = vld [vmem:[#allocation8 + $0x158] sm:$0xf0] }
  0xd5   :  { %1309 = vmatpush.bf16.msrb.mxu2 %v3195_v38  ;;  %1250 = vmatmul.bf16.vlgmr.msra.gmra.mxu1 %v4620_v53  ;;  %v4125_v38 = vld [vmem:[#allocation8 + $0x2ec] sm:$0xf]  ;;  %v3004_v37 = vld [vmem:[#allocation8 + $0x138] sm:$0xf0] }
  0xd6   :  { %1322 = vmatpush.bf16.msrb.mxu3 %v3323_v39  ;;  %1285 = vmatpush.bf16.msrb.mxu0 %v2907_v42  ;;  %v3228_v39 = vld [vmem:[#allocation8 + $0x2f8] sm:$0xf0]  ;;  %v4157_v42 = vld [vmem:[#allocation8 + $0x3ec] sm:$0xf] }
  0xd7   :  { %1298 = vmatpush.bf16.msrb.mxu1 %v3035_v43  ;;  %v3356_v43 = vld [vmem:[#allocation8 + $0x3f8] sm:$0xf0]  ;;  %v4073_v24 = vld [vmem:[#allocation8 + $0x14c] sm:$0xf] }
  0xd8   :  { %v4109_v28 = vld [vmem:[#allocation8 + $0x26c] sm:$0xf]  ;;  %v3023_v31 = vor.u32 %v4073_v24, %v3020_v25  ;;  %v3116_v9 = vld [vmem:[#allocation8 + $0x218] sm:$0xf0]  ;;  %v3714_v25 = vld [vmem:[#allocation11 + $0x2c0] sm:$0xf] }
  0xd9   :  { %1310 = vmatpush.bf16.msrb.mxu2 %v3179_v51  ;;  %v3231_v51 = vor.u32 %v4125_v38, %v3228_v39  ;;  %v4141_v32 = vld [vmem:[#allocation8 + $0x36c] sm:$0xf] }
  0xda   :  { %1323 = vmatpush.bf16.msrb.mxu3 %v3307_v52  ;;  %1286 = vmatpush.bf16.msrb.mxu0 %v2891_v56  ;;  %v3359_v52 = vor.u32 %v4157_v42, %v3356_v43  ;;  %v2943_v56 = vor.u32 %v4053_v44, %v2940_v46  ;;  %v4069_v36 = vld [vmem:[#allocation8 + $0x12c] sm:$0xf]  ;;  %v2879_v43 = vor.u32 %v4037_v34, %v2876_v35  ;;  %v4174_v34 = vld [vmem:[#allocation11 + $0x6c] sm:$0xf0] }
  0xdb   :  { %1299 = vmatpush.bf16.msrb.mxu1 %v3019_v57  ;;  %v3071_v57 = vor.u32 %v4085_v47, %v3068_v49  ;;  %v4137_v42 = vld [vmem:[#allocation8 + $0x34c] sm:$0xf]  ;;  %v3007_v44 = vor.u32 %v4069_v36, %v3004_v37  ;;  %v2860_v47 = vld [vmem:[#allocation8 + $0x18] sm:$0xf0]  ;;  %v3538_v36 = vld [vmem:[#allocation11 + $0x160] sm:$0xf] }
  0xdc   :  { %1263 = vmatmul.bf16.vlgmr.msra.gmra.mxu2 %v4624_v11  ;;  %v4033_v46 = vld [vmem:[#allocation8 + $0xc] sm:$0xf]  ;;  %v4206_v37 = vld [vmem:[#allocation11 + $0x16c] sm:$0xf0] }
  0xdd   :  { %1276 = vmatmul.bf16.vlgmr.msra.gmra.mxu3 %v4626_v17  ;;  %1311 = vmatpush.bf16.msrb.mxu2 %v3163_v0  ;;  %v3215_v0 = vor.u32 %v4121_v54, %v3212_v55  ;;  %v4065_v49 = vld [vmem:[#allocation8 + $0x10c] sm:$0xf]  ;;  %v4190_v54 = vld [vmem:[#allocation11 + $0xec] sm:$0xf0]  ;;  %v3602_v55 = vld [vmem:[#allocation11 + $0x1e0] sm:$0xf]  ;;  %v2863_v60 = vor.u32 %v4033_v46, %v2860_v47 }
  0xde   :  { %1324 = vmatpush.bf16.msrb.mxu3 %v3291_v1  ;;  %1287 = vmatpush.bf16.msrb.mxu0 %v2875_v5  ;;  %v3343_v1 = vor.u32 %v4153_v58, %v3340_v59  ;;  %v3055_v5 = vor.u32 %v4081_v62, %v3052_v63  ;;  %v4101_v58 = vld [vmem:[#allocation8 + $0x22c] sm:$0xf]  ;;  %v3132_v59 = vld [vmem:[#allocation8 + $0x238] sm:$0xf0]  ;;  %v3362_v47 = vld [vmem:[#allocation11] sm:$0xf] }
  0xdf   :  { %1300 = vmatpush.bf16.msrb.mxu1 %v3003_v6  ;;  %v4149_v6 = vld [vmem:[#allocation8 + $0x3ac] sm:$0xf]  ;;  %v3260_v63 = vld [vmem:[#allocation8 + $0x338] sm:$0xf0]  ;;  %v3135_v3 = vor.u32 %v4101_v58, %v3132_v59  ;;  %v4180_v58 = vld [vmem:[#allocation11 + $0xa4] sm:$0xf] }
  0xe0   :  { %v4133_v62 = vld [vmem:[#allocation8 + $0x32c] sm:$0xf]  ;;  %v3444_v59 = vld [vmem:[#allocation11 + $0xb0] sm:$0xf0] }
  0xe1   :  { %1312 = vmatpush.bf16.msrb.mxu2 %v3147_v14  ;;  %v3327_v14 = vor.u32 %v4149_v6, %v3324_v7  ;;  %v4218_v6 = vld [vmem:[#allocation11 + $0x1cc] sm:$0xf0]  ;;  %v3263_v7 = vor.u32 %v4133_v62, %v3260_v63  ;;  %v4097_v8 = vld [vmem:[#allocation8 + $0x20c] sm:$0xf]  ;;  %v3698_v63 = vld [vmem:[#allocation11 + $0x2a0] sm:$0xf] }
  0xe2   :  { %1325 = vmatpush.bf16.msrb.mxu3 %v3275_v19  ;;  %1288 = vmatpush.bf16.msrb.mxu0 %v2859_v22  ;;  %v3039_v19 = vor.u32 %v4077_v10, %v3036_v12  ;;  %v4041_v22 = vld [vmem:[#allocation8 + $0x4c] sm:$0xf]  ;;  %v3244_v12 = vld [vmem:[#allocation8 + $0x318] sm:$0xf0]  ;;  %v4198_v62 = vld [vmem:[#allocation11 + $0x12c] sm:$0xf0] }
  0xe3   :  { %1301 = vmatpush.bf16.msrb.mxu1 %v2987_v23  ;;  %v2892_v23 = vld [vmem:[#allocation8 + $0x58] sm:$0xf0]  ;;  %v4129_v10 = vld [vmem:[#allocation8 + $0x30c] sm:$0xf] }
  0xe4   :  { %v2895_v30 = vor.u32 %v4041_v22, %v2892_v23  ;;  %v3570_v22 = vld [vmem:[#allocation11 + $0x1a0] sm:$0xf]  ;;  %v4214_v23 = vld [vmem:[#allocation11 + $0x1ac] sm:$0xf0] }
  0xe5   :  { %1313 = vmatpush.bf16.msrb.mxu2 %v3131_v29  ;;  %1289 = vmatmul.bf16.vlgmr.msrb.gmra.mxu0 %v4618_v48  ;;  %v3164_v29 = vld [vmem:[#allocation8 + $0x278] sm:$0xf0] }
  0xe6   :  { %1333 = vmatpush.bf16.msra.mxu0 %v2975_v26  ;;  %1326 = vmatpush.bf16.msrb.mxu3 %v3259_v33  ;;  %v3183_v26 = vor.u32 %v4113_v15, %v3180_v16  ;;  %v3292_v33 = vld [vmem:[#allocation8 + $0x378] sm:$0xf0]  ;;  %v3167_v38 = vor.u32 %v4109_v28, %v3164_v29  ;;  %v3426_v28 = vld [vmem:[#allocation11 + $0x80] sm:$0xf]  ;;  %v4178_v29 = vld [vmem:[#allocation11 + $0x8c] sm:$0xf0] }
  0xe7   :  { %1346 = vmatpush.bf16.msra.mxu1 %v3103_v27  ;;  %v3311_v27 = vor.u32 %v4145_v20, %v3308_v21  ;;  %v3295_v39 = vor.u32 %v4141_v32, %v3292_v33  ;;  %v4182_v20 = vld [vmem:[#allocation11 + $0xac] sm:$0xf0]  ;;  %v3247_v21 = vor.u32 %v4129_v10, %v3244_v12  ;;  %v3427_v33 = vor.u32 %v4178_v29, %v3426_v28  ;;  %v3650_v29 = vld [vmem:[#allocation11 + $0x240] sm:$0xf] }
  0xe8   :  { %1302 = vmatmul.bf16.vlgmr.msrb.gmra.mxu1 %v4620_v53  ;;  %v4210_v32 = vld [vmem:[#allocation11 + $0x18c] sm:$0xf0] }
  0xe9   :  { %1314 = vmatpush.bf16.msrb.mxu2 %v3115_v45  ;;  %v3276_v45 = vld [vmem:[#allocation8 + $0x358] sm:$0xf0]  ;;  %v4242_v10 = vld [vmem:[#allocation11 + $0x28c] sm:$0xf0] }
  0xea   :  { %1334 = vmatpush.bf16.msra.mxu0 %v2959_v40  ;;  %1327 = vmatpush.bf16.msrb.mxu3 %v3243_v50  ;;  %v4105_v40 = vld [vmem:[#allocation8 + $0x24c] sm:$0xf]  ;;  %v2988_v50 = vld [vmem:[#allocation8 + $0x118] sm:$0xf0] }
  0xeb   :  { %1347 = vmatpush.bf16.msra.mxu1 %v3087_v41  ;;  %v3148_v41 = vld [vmem:[#allocation8 + $0x258] sm:$0xf0]  ;;  %v2991_v61 = vor.u32 %v4065_v49, %v2988_v50  ;;  %v4162_v49 = vld [vmem:[#allocation11 + $0xc] sm:$0xf0]  ;;  %v4188_v50 = vld [vmem:[#allocation11 + $0xe4] sm:$0xf] }
  0xec   :  { %1315 = vmatmul.bf16.vlgmr.msrb.gmra.mxu2 %v4624_v11 }
  0xed   :  { %1359 = vmatpush.bf16.msra.mxu2 %v3231_v51  ;;  %1328 = vmatmul.bf16.vlgmr.msrb.gmra.mxu3 %v4626_v17  ;;  %v3474_v51 = vld [vmem:[#allocation11 + $0xe0] sm:$0xf] }
  0xee   :  { %1372 = vmatpush.bf16.msra.mxu3 %v3359_v52  ;;  %1335 = vmatpush.bf16.msra.mxu0 %v2943_v56  ;;  %v3151_v52 = vor.u32 %v4105_v40, %v3148_v41  ;;  %v4222_v56 = vld [vmem:[#allocation11 + $0x1ec] sm:$0xf0]  ;;  %v3539_v41 = vor.u32 %v4206_v37, %v3538_v36  ;;  %v3634_v36 = vld [vmem:[#allocation11 + $0x220] sm:$0xf] }
  0xef   :  { %1348 = vmatpush.bf16.msra.mxu1 %v3071_v57  ;;  %v3279_v57 = vor.u32 %v4137_v42, %v3276_v45  ;;  %v3603_v2 = vor.u32 %v4222_v56, %v3602_v55  ;;  %v4170_v40 = vld [vmem:[#allocation11 + $0x4c] sm:$0xf0]  ;;  %v3522_v42 = vld [vmem:[#allocation11 + $0x140] sm:$0xf]  ;;  %v4184_v55 = vld [vmem:[#allocation11 + $0xc4] sm:$0xf] }
  0xf0   :  { %v4166_v45 = vld [vmem:[#allocation11 + $0x2c] sm:$0xf0]  ;;  %v3460_v56 = vld [vmem:[#allocation11 + $0xd0] sm:$0xf0] }
  0xf1   :  { %1360 = vmatpush.bf16.msra.mxu2 %v3215_v0  ;;  %v3475_v0 = vor.u32 %v4190_v54, %v3474_v51  ;;  %v3476_v51 = vld [vmem:[#allocation11 + $0xf0] sm:$0xf0]  ;;  %v4230_v37 = vld [vmem:[#allocation11 + $0x22c] sm:$0xf0] }
  0xf2   :  { %1373 = vmatpush.bf16.msra.mxu3 %v3343_v1  ;;  %1336 = vmatpush.bf16.msra.mxu0 %v2927_v4  ;;  %v3458_v1 = vld [vmem:[#allocation11 + $0xc0] sm:$0xf]  ;;  %v4186_v4 = vld [vmem:[#allocation11 + $0xcc] sm:$0xf0]  ;;  %v3479_v54 = vor.u32 %v4188_v50, %v3476_v51  ;;  %v3540_v50 = vld [vmem:[#allocation11 + $0x170] sm:$0xf0] }
  0xf3   :  { %1349 = vmatpush.bf16.msra.mxu1 %v3055_v5  ;;  %v3586_v5 = vld [vmem:[#allocation11 + $0x1c0] sm:$0xf]  ;;  %v3459_v15 = vor.u32 %v4186_v4, %v3458_v1  ;;  %v4246_v1 = vld [vmem:[#allocation11 + $0x2ac] sm:$0xf0] }
  0xf4   :  { %v3587_v16 = vor.u32 %v4218_v6, %v3586_v5  ;;  %v3699_v4 = vor.u32 %v4246_v1, %v3698_v63  ;;  %v3490_v6 = vld [vmem:[#allocation11 + $0x100] sm:$0xf] }
  0xf5   :  { %1361 = vmatpush.bf16.msra.mxu2 %v3199_v13  ;;  %v3730_v13 = vld [vmem:[#allocation11 + $0x2e0] sm:$0xf] }
  0xf6   :  { %1374 = vmatpush.bf16.msra.mxu3 %v3327_v14  ;;  %1337 = vmatpush.bf16.msra.mxu0 %v2911_v18  ;;  %v4254_v14 = vld [vmem:[#allocation11 + $0x2ec] sm:$0xf0]  ;;  %v3119_v18 = vor.u32 %v4097_v8, %v3116_v9  ;;  %v3682_v8 = vld [vmem:[#allocation11 + $0x280] sm:$0xf] }
  0xf7   :  { %1350 = vmatpush.bf16.msra.mxu1 %v3039_v19  ;;  %v3442_v19 = vld [vmem:[#allocation11 + $0xa0] sm:$0xf]  ;;  %v3731_v24 = vor.u32 %v4254_v14, %v3730_v13  ;;  %v3683_v12 = vor.u32 %v4242_v10, %v3682_v8  ;;  %v4172_v13 = vld [vmem:[#allocation11 + $0x64] sm:$0xf]  ;;  %v3412_v14 = vld [vmem:[#allocation11 + $0x70] sm:$0xf0] }
  0xf8   :  { %v3508_v8 = vld [vmem:[#allocation11 + $0x130] sm:$0xf0] }
  0xf9   :  { %1362 = vmatpush.bf16.msra.mxu2 %v3183_v26  ;;  %v4250_v26 = vld [vmem:[#allocation11 + $0x2cc] sm:$0xf0] }
  0xfa   :  { %1375 = vmatpush.bf16.msra.mxu3 %v3311_v27  ;;  %1338 = vmatpush.bf16.msra.mxu0 %v2895_v30  ;;  %v3443_v27 = vor.u32 %v4182_v20, %v3442_v19  ;;  %v3571_v30 = vor.u32 %v4214_v23, %v3570_v22  ;;  %v3666_v19 = vld [vmem:[#allocation11 + $0x260] sm:$0xf]  ;;  %v4238_v20 = vld [vmem:[#allocation11 + $0x26c] sm:$0xf0]  ;;  %v4168_v23 = vld [vmem:[#allocation11 + $0x44] sm:$0xf] }
  0xfb   :  { %1351 = vmatpush.bf16.msra.mxu1 %v3023_v31  ;;  %v3554_v31 = vld [vmem:[#allocation11 + $0x180] sm:$0xf]  ;;  %v3667_v22 = vor.u32 %v4238_v20, %v3666_v19  ;;  %v4192_v20 = vld [vmem:[#allocation11 + $0x104] sm:$0xf] }
  0xfc   :  { %v3555_v35 = vor.u32 %v4210_v32, %v3554_v31  ;;  %v4164_v32 = vld [vmem:[#allocation11 + $0x24] sm:$0xf] }
  0xfd   :  { %1363 = vmatpush.bf16.msra.mxu2 %v3167_v38 }
  0xfe   :  { %1376 = vmatpush.bf16.msra.mxu3 %v3295_v39  ;;  %1339 = vmatpush.bf16.msra.mxu0 %v2879_v43  ;;  %v3394_v39 = vld [vmem:[#allocation11 + $0x40] sm:$0xf]  ;;  %v4202_v43 = vld [vmem:[#allocation11 + $0x14c] sm:$0xf0] }
  0xff   :  { %1352 = vmatpush.bf16.msra.mxu1 %v3007_v44  ;;  %v3378_v44 = vld [vmem:[#allocation11 + $0x20] sm:$0xf] }
 0x100   :  { %v3379_v46 = vor.u32 %v4166_v45, %v3378_v44  ;;  %v3618_v44 = vld [vmem:[#allocation11 + $0x200] sm:$0xf]  ;;  %v4226_v45 = vld [vmem:[#allocation11 + $0x20c] sm:$0xf0] }
 0x101   :  { %1364 = vmatpush.bf16.msra.mxu2 %v3151_v52  ;;  %v3363_v52 = vor.u32 %v4162_v49, %v3362_v47  ;;  %v4286_v47 = vld [vmem:[#allocation11 + $0x3ec] sm:$0xf0]  ;;  %v4204_v49 = vld [vmem:[#allocation11 + $0x164] sm:$0xf] }
 0x102   :  { %1377 = vmatpush.bf16.msra.mxu3 %v3279_v57  ;;  %1340 = vmatpush.bf16.msra.mxu0 %v2863_v60  ;;  %v3463_v57 = vor.u32 %v4184_v55, %v3460_v56  ;;  %v3447_v60 = vor.u32 %v4180_v58, %v3444_v59  ;;  %v3732_v55 = vld [vmem:[#allocation11 + $0x2f0] sm:$0xf0]  ;;  %v4282_v58 = vld [vmem:[#allocation11 + $0x3cc] sm:$0xf0] }
 0x103   :  { %1353 = vmatpush.bf16.msra.mxu1 %v2991_v61  ;;  %v3506_v61 = vld [vmem:[#allocation11 + $0x120] sm:$0xf] }
 0x105   :  { %1365 = vmatpush.bf16.msra.mxu2 %v3135_v3  ;;  %1341 = vmatmul.bf16.vlgmr.msra.gmra.mxu0 %v4618_v48  ;;  %v3715_v48 = vor.u32 %v4250_v26, %v3714_v25  ;;  %v3428_v3 = vld [vmem:[#allocation11 + $0x90] sm:$0xf0]  ;;  %v4216_v25 = vld [vmem:[#allocation11 + $0x1c4] sm:$0xf] }
 0x106   :  { %2171 = vmatpush.bf16.msrb.mxu0 %v3475_v0  ;;  %1378 = vmatpush.bf16.msra.mxu3 %v3263_v7  ;;  %v3507_v0 = vor.u32 %v4198_v62, %v3506_v61  ;;  %v4194_v7 = vld [vmem:[#allocation11 + $0x10c] sm:$0xf0]  ;;  %v3524_v61 = vld [vmem:[#allocation11 + $0x150] sm:$0xf0]  ;;  %v4248_v62 = vld [vmem:[#allocation11 + $0x2c4] sm:$0xf] }
 0x107   :  { %2184 = vmatpush.bf16.msrb.mxu1 %v3603_v2  ;;  %v4176_v2 = vld [vmem:[#allocation11 + $0x84] sm:$0xf]  ;;  %v3491_v9 = vor.u32 %v4194_v7, %v3490_v6 }
 0x108   :  { %1354 = vmatmul.bf16.vlgmr.msra.gmra.mxu1 %v4620_v53  ;;  %v3410_v53 = vld [vmem:[#allocation11 + $0x60] sm:$0xf]  ;;  %v3431_v5 = vor.u32 %v4176_v2, %v3428_v3  ;;  %v4642_v2 = vld [vmem:[#allocation10] sm:$0xf]  ;;  %v4196_v7 = vld [vmem:[#allocation11 + $0x124] sm:$0xf] }
 0x109   :  { %1366 = vmatpush.bf16.msra.mxu2 %v3119_v18  ;;  %v3411_v38 = vor.u32 %v4174_v34, %v3410_v53  ;;  %v3604_v18 = vld [vmem:[#allocation11 + $0x1f0] sm:$0xf0]  ;;  %v3826_v3 = vld [vmem:[#allocation11 + $0x3a0] sm:$0xf] }
 0x10a   :  { %2172 = vmatpush.bf16.msrb.mxu0 %v3459_v15  ;;  %1379 = vmatpush.bf16.msra.mxu3 %v3247_v21  ;;  %v4220_v15 = vld [vmem:[#allocation11 + $0x1e4] sm:$0xf]  ;;  %v3572_v34 = vld [vmem:[#allocation11 + $0x1b0] sm:$0xf0] }
 0x10b   :  { %2185 = vmatpush.bf16.msrb.mxu1 %v3587_v16  ;;  %v3415_v16 = vor.u32 %v4172_v13, %v3412_v14  ;;  %v3607_v21 = vor.u32 %v4220_v15, %v3604_v18  ;;  %v3700_v13 = vld [vmem:[#allocation11 + $0x2b0] sm:$0xf0]  ;;  %v529_v14 = vperm.slane %v4642_v2, 0  ;;  %v4274_v18 = vld [vmem:[#allocation11 + $0x38c] sm:$0xf0] }
 0x10c   :  { %1367 = vmatmul.bf16.vlgmr.msra.gmra.mxu2 %v4624_v11  ;;  %v3395_v11 = vor.u32 %v4170_v40, %v3394_v39  ;;  %v4160_v39 = vld [vmem:[#allocation11 + $0x4] sm:$0xf]  ;;  %v3364_v40 = vld [vmem:[#allocation11 + $0x10] sm:$0xf0] }
 0x10d   :  { %2197 = vmatpush.bf16.msrb.mxu2 %v3731_v24  ;;  %1380 = vmatmul.bf16.vlgmr.msra.gmra.mxu3 %v4626_v17  ;;  %v3523_v17 = vor.u32 %v4202_v43, %v3522_v42  ;;  %v3396_v24 = vld [vmem:[#allocation11 + $0x50] sm:$0xf0]  ;;  %v3367_v42 = vor.u32 %v4160_v39, %v3364_v40 }
 0x10e   :  { %2173 = vmatpush.bf16.msrb.mxu0 %v3443_v27  ;;  %v3399_v26 = vor.u32 %v4168_v23, %v3396_v24  ;;  %v3588_v27 = vld [vmem:[#allocation11 + $0x1d0] sm:$0xf0] }
 0x10f   :  { %2186 = vmatpush.bf16.msrb.mxu1 %v3571_v30  ;;  %v3591_v28 = vor.u32 %v4216_v25, %v3588_v27  ;;  %v4234_v30 = vld [vmem:[#allocation11 + $0x24c] sm:$0xf0]  ;;  %v3556_v43 = vld [vmem:[#allocation11 + $0x190] sm:$0xf0]  ;;  %v3794_v27 = vld [vmem:[#allocation11 + $0x360] sm:$0xf] }
 0x110   :  { %v3651_v31 = vor.u32 %v4234_v30, %v3650_v29  ;;  %v3684_v24 = vld [vmem:[#allocation11 + $0x290] sm:$0xf0] }
 0x111   :  { %2198 = vmatpush.bf16.msrb.mxu2 %v3715_v48  ;;  %v3380_v48 = vld [vmem:[#allocation11 + $0x30] sm:$0xf0] }
 0x112   :  { %2174 = vmatpush.bf16.msrb.mxu0 %v3427_v33  ;;  %v4212_v33 = vld [vmem:[#allocation11 + $0x1a4] sm:$0xf]  ;;  %v3383_v53 = vor.u32 %v4164_v32, %v3380_v48  ;;  %v3668_v32 = vld [vmem:[#allocation11 + $0x270] sm:$0xf0] }
 0x113   :  { %2187 = vmatpush.bf16.msrb.mxu1 %v3555_v35  ;;  %v3575_v35 = vor.u32 %v4212_v33, %v3572_v34  ;;  %v3778_v34 = vld [vmem:[#allocation11 + $0x340] sm:$0xf] }
 0x115   :  { %2199 = vmatpush.bf16.msrb.mxu2 %v3699_v4  ;;  %v4278_v4 = vld [vmem:[#allocation11 + $0x3ac] sm:$0xf0] }
 0x116   :  { %2175 = vmatpush.bf16.msrb.mxu0 %v3411_v38  ;;  %v3635_v38 = vor.u32 %v4230_v37, %v3634_v36  ;;  %v3827_v6 = vor.u32 %v4278_v4, %v3826_v3  ;;  %v4232_v37 = vld [vmem:[#allocation11 + $0x244] sm:$0xf] }
 0x117   :  { %2188 = vmatpush.bf16.msrb.mxu1 %v3539_v41  ;;  %v4208_v41 = vld [vmem:[#allocation11 + $0x184] sm:$0xf] }
 0x119   :  { %2200 = vmatpush.bf16.msrb.mxu2 %v3683_v12  ;;  %v3511_v12 = vor.u32 %v4196_v7, %v3508_v8 }
 0x11a   :  { %2176 = vmatpush.bf16.msrb.mxu0 %v3395_v11  ;;  %v3559_v11 = vor.u32 %v4208_v41, %v3556_v43  ;;  %v3482_v43 = vld [vmem:[#allocation11 + $0xe8] sm:$0xf] }
 0x11b   :  { %2189 = vmatpush.bf16.msrb.mxu1 %v3523_v17  ;;  %v3858_v17 = vld [vmem:[#allocation11 + $0x3e0] sm:$0xf] }
 0x11c   :  { %v3859_v51 = vor.u32 %v4286_v47, %v3858_v17 }
 0x11d   :  { %2201 = vmatpush.bf16.msrb.mxu2 %v3667_v22  ;;  %v4240_v22 = vld [vmem:[#allocation11 + $0x284] sm:$0xf] }
 0x11e   :  { %2177 = vmatpush.bf16.msrb.mxu0 %v3379_v46  ;;  %v3619_v46 = vor.u32 %v4226_v45, %v3618_v44  ;;  %2210 = vmatpush.bf16.msrb.mxu3 %v3859_v51  ;;  %v4262_v44 = vld [vmem:[#allocation11 + $0x32c] sm:$0xf0] }
 0x11f   :  { %2190 = vmatpush.bf16.msrb.mxu1 %v3507_v0  ;;  %v3716_v0 = vld [vmem:[#allocation11 + $0x2d0] sm:$0xf0] }
 0x120   :  { %v3719_v1 = vor.u32 %v4248_v62, %v3716_v0  ;;  %v3620_v0 = vld [vmem:[#allocation11 + $0x210] sm:$0xf0] }
 0x121   :  { %2202 = vmatpush.bf16.msrb.mxu2 %v3651_v31  ;;  %v4236_v31 = vld [vmem:[#allocation11 + $0x264] sm:$0xf] }
 0x122   :  { %2178 = vmatpush.bf16.msrb.mxu0 %v3363_v52  ;;  %v3543_v52 = vor.u32 %v4204_v49, %v3540_v50  ;;  %v3671_v33 = vor.u32 %v4236_v31, %v3668_v32  ;;  %v4228_v49 = vld [vmem:[#allocation11 + $0x224] sm:$0xf]  ;;  %v3636_v50 = vld [vmem:[#allocation11 + $0x230] sm:$0xf0]  ;;  %v4175_v31 = vld [vmem:[#allocation11 + $0x74] sm:$0xf0] }
 0x123   :  { %2191 = vmatpush.bf16.msrb.mxu1 %v3491_v9  ;;  %v4244_v9 = vld [vmem:[#allocation11 + $0x2a4] sm:$0xf]  ;;  %v3610_v32 = vld [vmem:[#allocation11 + $0x1e8] sm:$0xf] }
 0x124   :  { %v3703_v15 = vor.u32 %v4244_v9, %v3700_v13  ;;  %v3450_v9 = vld [vmem:[#allocation11 + $0xa8] sm:$0xf]  ;;  %v4183_v13 = vld [vmem:[#allocation11 + $0xb4] sm:$0xf0] }
 0x125   :  { %2203 = vmatpush.bf16.msrb.mxu2 %v3635_v38  ;;  %v3652_v38 = vld [vmem:[#allocation11 + $0x250] sm:$0xf0] }
 0x126   :  { %2223 = vmatpush.bf16.msra.mxu0 %v3479_v54  ;;  %v4252_v54 = vld [vmem:[#allocation11 + $0x2e4] sm:$0xf]  ;;  %v3655_v40 = vor.u32 %v4232_v37, %v3652_v38 }
 0x127   :  { %2236 = vmatpush.bf16.msra.mxu1 %v3607_v21  ;;  %v3735_v56 = vor.u32 %v4252_v54, %v3732_v55  ;;  %v3492_v21 = vld [vmem:[#allocation11 + $0x110] sm:$0xf0]  ;;  %v530_v55 = vperm.slane %v4642_v2, 1 }
 0x128   :  { %v3495_v23 = vor.u32 %v4192_v20, %v3492_v21  ;;  %v3434_v20 = vld [vmem:[#allocation11 + $0x88] sm:$0xf] }
 0x129   :  { %2204 = vmatpush.bf16.msrb.mxu2 %v3619_v46  ;;  %v4191_v46 = vld [vmem:[#allocation11 + $0xf4] sm:$0xf0] }
 0x12a   :  { %2224 = vmatpush.bf16.msra.mxu0 %v3463_v57  ;;  %v3842_v57 = vld [vmem:[#allocation11 + $0x3c0] sm:$0xf] }
 0x12b   :  { %2237 = vmatpush.bf16.msra.mxu1 %v3591_v28  ;;  %v3843_v59 = vor.u32 %v4282_v58, %v3842_v57  ;;  %v4270_v28 = vld [vmem:[#allocation11 + $0x36c] sm:$0xf0]  ;;  %v3483_v57 = vor.u32 %v4191_v46, %v3482_v43  ;;  %v4187_v58 = vld [vmem:[#allocation11 + $0xd4] sm:$0xf0]  ;;  %v3594_v43 = vld [vmem:[#allocation11 + $0x1c8] sm:$0xf] }
 0x12c   :  { %v3795_v30 = vor.u32 %v4270_v28, %v3794_v27  ;;  %v531_v46 = vperm.slane %v4642_v2, 2 }
 0x12d   :  { %2249 = vmatpush.bf16.msra.mxu2 %v3735_v56  ;;  %2211 = vmatpush.bf16.msrb.mxu3 %v3843_v59  ;;  %v3466_v56 = vld [vmem:[#allocation11 + $0xc8] sm:$0xf]  ;;  %v3746_v59 = vld [vmem:[#allocation11 + $0x300] sm:$0xf] }
 0x12e   :  { %2225 = vmatpush.bf16.msra.mxu0 %v3447_v60  ;;  %v4200_v60 = vld [vmem:[#allocation11 + $0x144] sm:$0xf]  ;;  %v3467_v8 = vor.u32 %v4187_v58, %v3466_v56  ;;  %v3578_v56 = vld [vmem:[#allocation11 + $0x1a8] sm:$0xf] }
 0x12f   :  { %2238 = vmatpush.bf16.msra.mxu1 %v3575_v35  ;;  %v3527_v63 = vor.u32 %v4200_v60, %v3524_v61  ;;  %v4266_v35 = vld [vmem:[#allocation11 + $0x34c] sm:$0xf0]  ;;  %v4264_v58 = vld [vmem:[#allocation11 + $0x344] sm:$0xf] }
 0x130   :  { %v3779_v36 = vor.u32 %v4266_v35, %v3778_v34  ;;  %v4258_v60 = vld [vmem:[#allocation11 + $0x30c] sm:$0xf0]  ;;  %v3812_v34 = vld [vmem:[#allocation11 + $0x390] sm:$0xf0] }
 0x131   :  { %2250 = vmatpush.bf16.msra.mxu2 %v3719_v1  ;;  %2212 = vmatpush.bf16.msrb.mxu3 %v3827_v6  ;;  %v3747_v62 = vor.u32 %v4258_v60, %v3746_v59  ;;  %v4284_v1 = vld [vmem:[#allocation11 + $0x3e4] sm:$0xf]  ;;  %v3780_v59 = vld [vmem:[#allocation11 + $0x350] sm:$0xf0] }
 0x132   :  { %2226 = vmatpush.bf16.msra.mxu0 %v3431_v5 }
 0x133   :  { %2239 = vmatpush.bf16.msra.mxu1 %v3559_v11  ;;  %v3762_v11 = vld [vmem:[#allocation11 + $0x320] sm:$0xf] }
 0x134   :  { %v3763_v47 = vor.u32 %v4262_v44, %v3762_v11  ;;  %v4219_v44 = vld [vmem:[#allocation11 + $0x1d4] sm:$0xf0] }
 0x135   :  { %2251 = vmatpush.bf16.msra.mxu2 %v3703_v15  ;;  %v3844_v15 = vld [vmem:[#allocation11 + $0x3d0] sm:$0xf0] }
 0x136   :  { %2227 = vmatpush.bf16.msra.mxu0 %v3415_v16  ;;  %v3810_v16 = vld [vmem:[#allocation11 + $0x380] sm:$0xf] }
 0x137   :  { %2240 = vmatpush.bf16.msra.mxu1 %v3543_v52  ;;  %v3811_v19 = vor.u32 %v4274_v18, %v3810_v16  ;;  %v3639_v52 = vor.u32 %v4228_v49, %v3636_v50 }
 0x139   :  { %2213 = vmatpush.bf16.msrb.mxu3 %v3811_v19  ;;  %v3451_v19 = vor.u32 %v4183_v13, %v3450_v9  ;;  %v3764_v9 = vld [vmem:[#allocation11 + $0x330] sm:$0xf0]  ;;  %v3484_v13 = vld [vmem:[#allocation11 + $0xf8] sm:$0xf0] }
 0x13a   :  { %2228 = vmatpush.bf16.msra.mxu0 %v3399_v26  ;;  %v3687_v26 = vor.u32 %v4240_v22, %v3684_v24  ;;  %v4179_v22 = vld [vmem:[#allocation11 + $0x94] sm:$0xf0]  ;;  %v3828_v24 = vld [vmem:[#allocation11 + $0x3b0] sm:$0xf0] }
 0x13b   :  { %2241 = vmatpush.bf16.msra.mxu1 %v3527_v63  ;;  %v4224_v63 = vld [vmem:[#allocation11 + $0x204] sm:$0xf] }
 0x13c   :  { %2252 = vmatpush.bf16.msra.mxu2 %v3687_v26  ;;  %v3623_v4 = vor.u32 %v4224_v63, %v3620_v0  ;;  %v3783_v63 = vor.u32 %v4264_v58, %v3780_v59  ;;  %v3690_v58 = vld [vmem:[#allocation11 + $0x288] sm:$0xf]  ;;  %v4243_v59 = vld [vmem:[#allocation11 + $0x294] sm:$0xf0] }
 0x13d   :  { %2214 = vmatpush.bf16.msrb.mxu3 %v3795_v30  ;;  %v3418_v30 = vld [vmem:[#allocation11 + $0x68] sm:$0xf] }
 0x13e   :  { %2229 = vmatpush.bf16.msra.mxu0 %v3383_v53 }
 0x13f   :  { %2242 = vmatpush.bf16.msra.mxu1 %v3511_v12 }
 0x140   :  { %2253 = vmatpush.bf16.msra.mxu2 %v3671_v33  ;;  %v4223_v33 = vld [vmem:[#allocation11 + $0x1f4] sm:$0xf0] }
 0x141   :  { %v1186_v5 = vpop.f32.mrf.mxu0  ;;  %2215 = vmatpush.bf16.msrb.mxu3 %v3779_v36 }
 0x142   :  { %2230 = vmatpush.bf16.msra.mxu0 %v3367_v42  ;;  %v1199_v10 = vpop.f32.mrf.mxu1  ;;  %v1187_v25 = vadd.f32 %v1186_v5, %v529_v14  ;;  %v3860_v5 = vld [vmem:[#allocation11 + $0x3f0] sm:$0xf0]  ;;  %v4280_v14 = vld [vmem:[#allocation11 + $0x3c4] sm:$0xf] }
 0x143   :  { %2243 = vmatpush.bf16.msra.mxu1 %v3495_v23  ;;  %v3863_v7 = vor.u32 %v4284_v1, %v3860_v5  ;;  %v3847_v18 = vor.u32 %v4280_v14, %v3844_v15  ;;  %v4276_v23 = vld [vmem:[#allocation11 + $0x3a4] sm:$0xf]  ;;  %v4163_v5 = vld [vmem:[#allocation11 + $0x14] sm:$0xf0] }
 0x144   :  { %v1200_v53 = vadd.f32 %v1199_v10, %v1187_v25  ;;  %2254 = vmatpush.bf16.msra.mxu2 %v3655_v40  ;;  %v3831_v26 = vor.u32 %v4276_v23, %v3828_v24  ;;  %v3611_v40 = vor.u32 %v4223_v33, %v3610_v32  ;;  %v3738_v24 = vld [vmem:[#allocation11 + $0x2e8] sm:$0xf] }
 0x145   :  { %2216 = vmatpush.bf16.msrb.mxu3 %v3763_v47 }
 0x148   :  { %2255 = vmatpush.bf16.msra.mxu2 %v3639_v52  ;;  %v3595_v52 = vor.u32 %v4219_v44, %v3594_v43 }
 0x149   :  { %v1188_v29 = vpop.f32.mrf.mxu0  ;;  %2217 = vmatpush.bf16.msrb.mxu3 %v3747_v62 }
 0x14a   :  { %v1201_v48 = vpop.f32.mrf.mxu1  ;;  %v3435_v29 = vor.u32 %v4179_v22, %v3434_v20  ;;  %v4207_v22 = vld [vmem:[#allocation11 + $0x174] sm:$0xf0] }
 0x14c   :  { %2256 = vmatpush.bf16.msra.mxu2 %v3623_v4  ;;  %v3370_v4 = vld [vmem:[#allocation11 + $0x8] sm:$0xf] }
 0x14d   :  { %2262 = vmatpush.bf16.msra.mxu3 %v3863_v7  ;;  %v4211_v7 = vld [vmem:[#allocation11 + $0x194] sm:$0xf0] }
 0x14f   :  { %v1212_v39 = vpop.f32.mrf.mxu2 }
 0x150   :  { %v1213_v41 = vadd.f32 %v1212_v39, %v1200_v53  ;;  %v1225_v42 = vpop.f32.mrf.mxu3  ;;  %v4272_v53 = vld [vmem:[#allocation11 + $0x384] sm:$0xf]  ;;  %v3419_v39 = vor.u32 %v4175_v31, %v3418_v30  ;;  %v3468_v30 = vld [vmem:[#allocation11 + $0xd8] sm:$0xf0] }
 0x151   :  { %v1238_v17 = vpop.f32.mrf.mxu0  ;;  %2263 = vmatpush.bf16.msra.mxu3 %v3847_v18  ;;  %v3815_v36 = vor.u32 %v4272_v53, %v3812_v34  ;;  %v3530_v34 = vld [vmem:[#allocation11 + $0x148] sm:$0xf] }
 0x152   :  { %v1226_v45 = vadd.f32 %v1225_v42, %v1213_v41  ;;  %v1251_v51 = vpop.f32.mrf.mxu1  ;;  %v1239_v10 = vadd.f32 %v1238_v17, %v530_v55  ;;  %v3402_v41 = vld [vmem:[#allocation11 + $0x48] sm:$0xf]  ;;  %v4171_v42 = vld [vmem:[#allocation11 + $0x54] sm:$0xf0]  ;;  %v3796_v17 = vld [vmem:[#allocation11 + $0x370] sm:$0xf0] }
 0x153   :  { %v4167_v55 = vld [vmem:[#allocation11 + $0x34] sm:$0xf0] }
 0x154   :  { %v1385_v54 = vmax.f32 %v1226_v45, 0.0  ;;  %v1252_v21 = vadd.f32 %v1251_v51, %v1239_v10  ;;  %v4268_v45 = vld [vmem:[#allocation11 + $0x364] sm:$0xf]  ;;  %v3403_v51 = vor.u32 %v4171_v42, %v3402_v41 }
 0x155   :  { %2264 = vmatpush.bf16.msra.mxu3 %v3831_v26  ;;  %v3799_v49 = vor.u32 %v4268_v45, %v3796_v17  ;;  %v3748_v26 = vld [vmem:[#allocation11 + $0x310] sm:$0xf0]  ;;  %v3514_v17 = vld [vmem:[#allocation11 + $0x128] sm:$0xf] }
 0x156   :  { %v4646_v61 = vpack.c.bf16 %v1385_v54, %v1385_v54  ;;  %v3386_v54 = vld [vmem:[#allocation11 + $0x28] sm:$0xf] }
 0x157   :  { %v1214_v3 = vpop.f32.mrf.mxu2  ;;  %v3387_v1 = vor.u32 %v4167_v55, %v3386_v54 }
 0x158   :  { %v1227_v6 = vpop.f32.mrf.mxu3  ;;  %2179 = vmatmul.bf16.vlgmr.msrb.gmra.mxu0 %v4646_v61 }
 0x159   :  { %2275 = vmatpush.bf16.msrb.mxu0 %v3483_v57  ;;  %v1240_v12 = vpop.f32.mrf.mxu0  ;;  %2265 = vmatpush.bf16.msra.mxu3 %v3815_v36  ;;  %v4215_v57 = vld [vmem:[#allocation11 + $0x1b4] sm:$0xf0]  ;;  %v3562_v6 = vld [vmem:[#allocation11 + $0x188] sm:$0xf] }
 0x15a   :  { %v1253_v16 = vpop.f32.mrf.mxu1  ;;  %v3579_v3 = vor.u32 %v4215_v57, %v3578_v56  ;;  %v4189_v12 = vld [vmem:[#allocation11 + $0xec] sm:$0xf]  ;;  %v3563_v20 = vor.u32 %v4211_v7, %v3562_v6  ;;  %v3722_v36 = vld [vmem:[#allocation11 + $0x2c8] sm:$0xf]  ;;  %v4195_v57 = vld [vmem:[#allocation11 + $0x114] sm:$0xf0]  ;;  %v3691_v6 = vor.u32 %v4243_v59, %v3690_v58 }
 0x15b   :  { %v3487_v23 = vor.u32 %v4189_v12, %v3484_v13  ;;  %v3498_v56 = vld [vmem:[#allocation11 + $0x108] sm:$0xf]  ;;  %v4169_v12 = vld [vmem:[#allocation11 + $0x4c] sm:$0xf]  ;;  %v3404_v13 = vld [vmem:[#allocation11 + $0x58] sm:$0xf0] }
 0x15c   :  { %v3850_v59 = vld [vmem:[#allocation11 + $0x3c8] sm:$0xf] }
 0x15d   :  { %2276 = vmatpush.bf16.msrb.mxu0 %v3467_v8  ;;  %2266 = vmatpush.bf16.msra.mxu3 %v3799_v49  ;;  %v4260_v8 = vld [vmem:[#allocation11 + $0x324] sm:$0xf]  ;;  %v4247_v49 = vld [vmem:[#allocation11 + $0x2b4] sm:$0xf0] }
 0x15e   :  { %v3767_v14 = vor.u32 %v4260_v8, %v3764_v9  ;;  %v3674_v8 = vld [vmem:[#allocation11 + $0x268] sm:$0xf] }
 0x15f   :  { %v1264_v25 = vpop.f32.mrf.mxu2 }
 0x160   :  { %v1265_v27 = vadd.f32 %v1264_v25, %v1252_v21  ;;  %v1277_v28 = vpop.f32.mrf.mxu3  ;;  %v3546_v21 = vld [vmem:[#allocation11 + $0x168] sm:$0xf]  ;;  %v4256_v25 = vld [vmem:[#allocation11 + $0x304] sm:$0xf] }
 0x161   :  { %2277 = vmatpush.bf16.msrb.mxu0 %v3451_v19  ;;  %2267 = vmatpush.bf16.msra.mxu3 %v3783_v63  ;;  %v3371_v19 = vor.u32 %v4163_v5, %v3370_v4  ;;  %v3751_v31 = vor.u32 %v4256_v25, %v3748_v26  ;;  %v3499_v4 = vor.u32 %v4195_v57, %v3498_v56  ;;  %v532_v5 = vperm.slane %v4642_v2, 3  ;;  %v4213_v25 = vld [vmem:[#allocation11 + $0x1ac] sm:$0xf]  ;;  %v3580_v26 = vld [vmem:[#allocation11 + $0x1b8] sm:$0xf0] }
 0x162   :  { %v1278_v48 = vadd.f32 %v1277_v28, %v1265_v27  ;;  %v1290_v35 = vpop.f32.mrf.mxu0  ;;  %v4255_v28 = vld [vmem:[#allocation11 + $0x2f4] sm:$0xf0] }
 0x163   :  { %v1291_v60 = vadd.f32 %v1290_v35, %v531_v46  ;;  %v3739_v33 = vor.u32 %v4255_v28, %v3738_v24  ;;  %v4203_v35 = vld [vmem:[#allocation11 + $0x154] sm:$0xf0] }
 0x164   :  { %v1386_v37 = vmax.f32 %v1278_v48, 0.0  ;;  %v3547_v48 = vor.u32 %v4207_v22, %v3546_v21  ;;  %v3531_v43 = vor.u32 %v4203_v35, %v3530_v34  ;;  %v4199_v46 = vld [vmem:[#allocation11 + $0x134] sm:$0xf0]  ;;  %v4165_v22 = vld [vmem:[#allocation11 + $0x2c] sm:$0xf] }
 0x165   :  { %v1303_v38 = vpop.f32.mrf.mxu1  ;;  %2278 = vmatpush.bf16.msrb.mxu0 %v3435_v29  ;;  %2268 = vmatpush.bf16.msra.mxu3 %v3767_v14  ;;  %v4185_v29 = vld [vmem:[#allocation11 + $0xcc] sm:$0xf]  ;;  %v4235_v21 = vld [vmem:[#allocation11 + $0x254] sm:$0xf0] }
 0x166   :  { %v4649_v11 = vpack.c.bf16 %v1386_v37, %v1386_v37  ;;  %v1304_v10 = vadd.f32 %v1303_v38, %v1291_v60  ;;  %v3471_v53 = vor.u32 %v4185_v29, %v3468_v30  ;;  %v4251_v38 = vld [vmem:[#allocation11 + $0x2d4] sm:$0xf0]  ;;  %v4173_v60 = vld [vmem:[#allocation11 + $0x6c] sm:$0xf]  ;;  %v3642_v30 = vld [vmem:[#allocation11 + $0x228] sm:$0xf] }
 0x167   :  { %v1266_v47 = vpop.f32.mrf.mxu2  ;;  %v3723_v44 = vor.u32 %v4251_v38, %v3722_v36  ;;  %v4217_v14 = vld [vmem:[#allocation11 + $0x1cc] sm:$0xf]  ;;  %v3564_v36 = vld [vmem:[#allocation11 + $0x198] sm:$0xf0] }
 0x168   :  { %v1279_v50 = vpop.f32.mrf.mxu3  ;;  %2192 = vmatmul.bf16.vlgmr.msrb.gmra.mxu1 %v4649_v11  ;;  %2231 = vmatmul.bf16.vlgmr.msra.gmra.mxu0 %v4646_v61  ;;  %v3706_v47 = vld [vmem:[#allocation11 + $0x2a8] sm:$0xf]  ;;  %v4209_v35 = vld [vmem:[#allocation11 + $0x18c] sm:$0xf] }
 0x169   :  { %2279 = vmatpush.bf16.msrb.mxu0 %v3419_v39  ;;  %2288 = vmatpush.bf16.msrb.mxu1 %v3611_v40  ;;  %v4181_v39 = vld [vmem:[#allocation11 + $0xac] sm:$0xf]  ;;  %v3452_v40 = vld [vmem:[#allocation11 + $0xb8] sm:$0xf0]  ;;  %v3707_v54 = vor.u32 %v4247_v49, %v3706_v47 }
 0x16a   :  { %v1292_v62 = vpop.f32.mrf.mxu0  ;;  %2269 = vmatpush.bf16.msra.mxu3 %v3751_v31  ;;  %v3455_v45 = vor.u32 %v4181_v39, %v3452_v40  ;;  %v4177_v50 = vld [vmem:[#allocation11 + $0x8c] sm:$0xf]  ;;  %v3548_v49 = vld [vmem:[#allocation11 + $0x178] sm:$0xf0] }
 0x16b   :  { %v3420_v62 = vld [vmem:[#allocation11 + $0x78] sm:$0xf0]  ;;  %v4205_v47 = vld [vmem:[#allocation11 + $0x16c] sm:$0xf] }
 0x16c   :  { %v3423_v7 = vor.u32 %v4173_v60, %v3420_v62  ;;  %v3551_v57 = vor.u32 %v4205_v47, %v3548_v49  ;;  %v4283_v60 = vld [vmem:[#allocation11 + $0x3d4] sm:$0xf0]  ;;  %v4201_v62 = vld [vmem:[#allocation11 + $0x14c] sm:$0xf]  ;;  %v3868_v47 = vld [vmem:[#allocation11 + $0x3f8] sm:$0xf0] }
 0x16d   :  { %v1305_v0 = vpop.f32.mrf.mxu1  ;;  %2280 = vmatpush.bf16.msrb.mxu0 %v3403_v51  ;;  %2289 = vmatpush.bf16.msrb.mxu1 %v3595_v52  ;;  %v3436_v51 = vld [vmem:[#allocation11 + $0x98] sm:$0xf0]  ;;  %v3515_v52 = vor.u32 %v4199_v46, %v3514_v17  ;;  %v3866_v17 = vld [vmem:[#allocation11 + $0x3e8] sm:$0xf]  ;;  %v4287_v46 = vld [vmem:[#allocation11 + $0x3f4] sm:$0xf0] }
 0x16e   :  { %v3439_v55 = vor.u32 %v4177_v50, %v3436_v51  ;;  %v4221_v0 = vld [vmem:[#allocation11 + $0x1ec] sm:$0xf]  ;;  %v3740_v51 = vld [vmem:[#allocation11 + $0x2f8] sm:$0xf0] }
 0x16f   :  { %v1316_v15 = vpop.f32.mrf.mxu2  ;;  %v4253_v50 = vld [vmem:[#allocation11 + $0x2ec] sm:$0xf] }
 0x170   :  { %v1329_v16 = vpop.f32.mrf.mxu3  ;;  %v1317_v18 = vadd.f32 %v1316_v15, %v1304_v10  ;;  %v4239_v10 = vld [vmem:[#allocation11 + $0x274] sm:$0xf0]  ;;  %v3596_v15 = vld [vmem:[#allocation11 + $0x1d8] sm:$0xf0]  ;;  %v3743_v58 = vor.u32 %v4253_v50, %v3740_v51  ;;  %v4281_v51 = vld [vmem:[#allocation11 + $0x3cc] sm:$0xf] }
 0x171   :  { %2281 = vmatpush.bf16.msrb.mxu0 %v3387_v1  ;;  %2290 = vmatpush.bf16.msrb.mxu1 %v3579_v3  ;;  %v3612_v1 = vld [vmem:[#allocation11 + $0x1f8] sm:$0xf0]  ;;  %v3599_v2 = vor.u32 %v4217_v14, %v3596_v15 }
 0x172   :  { %v1330_v27 = vadd.f32 %v1329_v16, %v1317_v18  ;;  %v3615_v9 = vor.u32 %v4221_v0, %v3612_v1  ;;  %v3675_v16 = vor.u32 %v4239_v10, %v3674_v8  ;;  %v3407_v18 = vor.u32 %v4169_v12, %v3404_v13  ;;  %v3532_v0 = vld [vmem:[#allocation11 + $0x158] sm:$0xf0]  ;;  %v4249_v1 = vld [vmem:[#allocation11 + $0x2cc] sm:$0xf]  ;;  %v3834_v8 = vld [vmem:[#allocation11 + $0x3a8] sm:$0xf] }
 0x173   :  { %v4197_v10 = vld [vmem:[#allocation11 + $0x12c] sm:$0xf]  ;;  %v3516_v12 = vld [vmem:[#allocation11 + $0x138] sm:$0xf0] }
 0x174   :  { %v1387_v32 = vmax.f32 %v1330_v27, 0.0  ;;  %v4245_v13 = vld [vmem:[#allocation11 + $0x2ac] sm:$0xf]  ;;  %v3708_v14 = vld [vmem:[#allocation11 + $0x2b8] sm:$0xf0] }
 0x175   :  { %2282 = vmatpush.bf16.msrb.mxu0 %v3371_v19  ;;  %2291 = vmatpush.bf16.msrb.mxu1 %v3563_v20  ;;  %v3658_v19 = vld [vmem:[#allocation11 + $0x248] sm:$0xf] }
 0x176   :  { %v4654_v37 = vpack.c.bf16 %v1387_v32, %v1387_v32  ;;  %v3659_v28 = vor.u32 %v4235_v21, %v3658_v19  ;;  %v3583_v32 = vor.u32 %v4213_v25, %v3580_v26  ;;  %v4275_v19 = vld [vmem:[#allocation11 + $0x394] sm:$0xf0]  ;;  %v4241_v21 = vld [vmem:[#allocation11 + $0x28c] sm:$0xf]  ;;  %v3802_v26 = vld [vmem:[#allocation11 + $0x368] sm:$0xf] }
 0x177   :  { %v1318_v41 = vpop.f32.mrf.mxu2 }
 0x178   :  { %v1331_v42 = vpop.f32.mrf.mxu3  ;;  %2244 = vmatmul.bf16.vlgmr.msra.gmra.mxu1 %v4649_v11  ;;  %2283 = vmatmul.bf16.vlgmr.msrb.gmra.mxu0 %v4646_v61 }
 0x179   :  { %2327 = vmatpush.bf16.msra.mxu0 %v3487_v23  ;;  %2205 = vmatmul.bf16.vlgmr.msrb.gmra.mxu2 %v4654_v37  ;;  %v3388_v23 = vld [vmem:[#allocation11 + $0x38] sm:$0xf0]  ;;  %v3626_v42 = vld [vmem:[#allocation11 + $0x208] sm:$0xf] }
 0x17a   :  { %2292 = vmatpush.bf16.msrb.mxu1 %v3547_v48  ;;  %2301 = vmatpush.bf16.msrb.mxu2 %v3739_v33  ;;  %v3391_v29 = vor.u32 %v4165_v22, %v3388_v23  ;;  %v4231_v48 = vld [vmem:[#allocation11 + $0x234] sm:$0xf0]  ;;  %v4161_v33 = vld [vmem:[#allocation11 + $0xc] sm:$0xf]  ;;  %v3692_v22 = vld [vmem:[#allocation11 + $0x298] sm:$0xf0] }
 0x17b   :  { %v3643_v40 = vor.u32 %v4231_v48, %v3642_v30  ;;  %v3695_v25 = vor.u32 %v4241_v21, %v3692_v22  ;;  %v4267_v48 = vld [vmem:[#allocation11 + $0x354] sm:$0xf0] }
 0x17c   :  { %v4291_v21 = vld [vmem:[#allocation13 + $0x18] sm:$0xff] }
 0x17d   :  { %2328 = vmatpush.bf16.msra.mxu0 %v3471_v53  ;;  %v3372_v53 = vld [vmem:[#allocation11 + $0x18] sm:$0xf0] }
 0x17e   :  { %2293 = vmatpush.bf16.msrb.mxu1 %v3531_v43  ;;  %2302 = vmatpush.bf16.msrb.mxu2 %v3723_v44  ;;  %v3375_v41 = vor.u32 %v4161_v33, %v3372_v53  ;;  %v4227_v43 = vld [vmem:[#allocation11 + $0x214] sm:$0xf0]  ;;  %v4233_v33 = vld [vmem:[#allocation11 + $0x24c] sm:$0xf]  ;;  %v3660_v53 = vld [vmem:[#allocation11 + $0x258] sm:$0xf0] }
 0x17f   :  { %v4303_v22 = vld [vmem:[#allocation13 + $0x78] sm:$0xff] }
 0x181   :  { %2329 = vmatpush.bf16.msra.mxu0 %v3455_v45  ;;  %v3567_v45 = vor.u32 %v4209_v35, %v3564_v36  ;;  %v3663_v35 = vor.u32 %v4233_v33, %v3660_v53  ;;  %v3770_v36 = vld [vmem:[#allocation11 + $0x328] sm:$0xf]  ;;  %v4311_v33 = vld [vmem:[#allocation13 + $0xb8] sm:$0xff]  ;;  %v4298_v53 = vld [vmem:[#allocation13 + $0x50] sm:$0xff] }
 0x182   :  { %v1342_v63 = vpop.f32.mrf.mxu0  ;;  %2294 = vmatpush.bf16.msrb.mxu1 %v3515_v52  ;;  %2303 = vmatpush.bf16.msrb.mxu2 %v3707_v54  ;;  %v3627_v54 = vor.u32 %v4227_v43, %v3626_v42  ;;  %v3754_v43 = vld [vmem:[#allocation11 + $0x308] sm:$0xf] }
 0x183   :  { %v1343_v20 = vadd.f32 %v1342_v63, %v532_v5  ;;  %v3851_v5 = vor.u32 %v4283_v60, %v3850_v59  ;;  %v4273_v59 = vld [vmem:[#allocation11 + $0x38c] sm:$0xf]  ;;  %v3820_v60 = vld [vmem:[#allocation11 + $0x398] sm:$0xf0] }
 0x185   :  { %v1355_v3 = vpop.f32.mrf.mxu1  ;;  %2330 = vmatpush.bf16.msra.mxu0 %v3439_v55  ;;  %v3867_v55 = vor.u32 %v4287_v46, %v3866_v17  ;;  %v3628_v17 = vld [vmem:[#allocation11 + $0x218] sm:$0xf0]  ;;  %v4285_v46 = vld [vmem:[#allocation11 + $0x3ec] sm:$0xf] }
 0x186   :  { %2295 = vmatpush.bf16.msrb.mxu1 %v3499_v4  ;;  %2304 = vmatpush.bf16.msrb.mxu2 %v3691_v6  ;;  %v1356_v31 = vadd.f32 %v1355_v3, %v1343_v20  ;;  %v3724_v3 = vld [vmem:[#allocation11 + $0x2d8] sm:$0xf0]  ;;  %v3535_v6 = vor.u32 %v4201_v62, %v3532_v0  ;;  %v4193_v20 = vld [vmem:[#allocation11 + $0x10c] sm:$0xf]  ;;  %v3871_v50 = vor.u32 %v4285_v46, %v3868_v47  ;;  %v4306_v46 = vld [vmem:[#allocation13 + $0x90] sm:$0xff] }
 0x187   :  { %v3823_v62 = vor.u32 %v4273_v59, %v3820_v60  ;;  %v3804_v0 = vld [vmem:[#allocation11 + $0x378] sm:$0xf0]  ;;  %v4304_v59 = vld [vmem:[#allocation13 + $0x80] sm:$0xff] }
 0x188   :  { %v4319_v60 = vld [vmem:[#allocation13 + $0xf8] sm:$0xff] }
 0x189   :  { %2331 = vmatpush.bf16.msra.mxu0 %v3423_v7  ;;  %2296 = vmatmul.bf16.vlgmr.msrb.gmra.mxu1 %v4649_v11  ;;  %v3727_v7 = vor.u32 %v4249_v1, %v3724_v3  ;;  %v4265_v3 = vld [vmem:[#allocation11 + $0x34c] sm:$0xf] }
 0x18a   :  { %2340 = vmatpush.bf16.msra.mxu1 %v3615_v9  ;;  %v1344_v24 = vpop.f32.mrf.mxu0  ;;  %2257 = vmatmul.bf16.vlgmr.msra.gmra.mxu2 %v4654_v37  ;;  %v4279_v9 = vld [vmem:[#allocation11 + $0x3b4] sm:$0xf0] }
 0x18b   :  { %2305 = vmatpush.bf16.msrb.mxu2 %v3675_v16  ;;  %v3835_v15 = vor.u32 %v4279_v9, %v3834_v8  ;;  %v3711_v16 = vor.u32 %v4245_v13, %v3708_v14  ;;  %v4257_v9 = vld [vmem:[#allocation11 + $0x30c] sm:$0xf]  ;;  %v4295_v14 = vld [vmem:[#allocation13 + $0x38] sm:$0xff] }
 0x18d   :  { %v1357_v27 = vpop.f32.mrf.mxu1  ;;  %2332 = vmatpush.bf16.msra.mxu0 %v3407_v18  ;;  %v3818_v18 = vld [vmem:[#allocation11 + $0x388] sm:$0xf] }
 0x18e   :  { %2341 = vmatpush.bf16.msra.mxu1 %v3599_v2  ;;  %v3500_v2 = vld [vmem:[#allocation11 + $0x118] sm:$0xf0]  ;;  %v3819_v23 = vor.u32 %v4275_v19, %v3818_v18  ;;  %v4271_v27 = vld [vmem:[#allocation11 + $0x374] sm:$0xf0]  ;;  %v4293_v18 = vld [vmem:[#allocation13 + $0x28] sm:$0xff] }
 0x18f   :  { %v1368_v34 = vpop.f32.mrf.mxu2  ;;  %2306 = vmatpush.bf16.msrb.mxu2 %v3659_v28  ;;  %v3503_v24 = vor.u32 %v4193_v20, %v3500_v2  ;;  %v4237_v28 = vld [vmem:[#allocation11 + $0x26c] sm:$0xf]  ;;  %v3803_v30 = vor.u32 %v4271_v27, %v3802_v26  ;;  %v4292_v19 = vld [vmem:[#allocation13 + $0x20] sm:$0xff] }
 0x190   :  { %v1369_v38 = vadd.f32 %v1368_v34, %v1356_v31  ;;  %v1381_v39 = vpop.f32.mrf.mxu3  ;;  %v4289_v26 = vld [vmem:[#allocation13 + $0x8] sm:$0xff] }
 0x191   :  { %2333 = vmatpush.bf16.msra.mxu0 %v3391_v29  ;;  %v3676_v29 = vld [vmem:[#allocation11 + $0x278] sm:$0xf0]  ;;  %v4301_v27 = vld [vmem:[#allocation13 + $0x68] sm:$0xff] }
 0x192   :  { %v1382_v44 = vadd.f32 %v1381_v39, %v1369_v38  ;;  %2342 = vmatpush.bf16.msra.mxu1 %v3583_v32  ;;  %v3679_v31 = vor.u32 %v4237_v28, %v3676_v29  ;;  %v3786_v32 = vld [vmem:[#allocation11 + $0x348] sm:$0xf]  ;;  %v4263_v38 = vld [vmem:[#allocation11 + $0x334] sm:$0xf0]  ;;  %v4229_v39 = vld [vmem:[#allocation11 + $0x22c] sm:$0xf] }
 0x193   :  { %2307 = vmatpush.bf16.msrb.mxu2 %v3643_v40  ;;  %v3787_v34 = vor.u32 %v4267_v48, %v3786_v32  ;;  %v3644_v40 = vld [vmem:[#allocation11 + $0x238] sm:$0xf0]  ;;  %v4288_v28 = vld [vmem:[#allocation13] sm:$0xff] }
 0x194   :  { %v1388_v52 = vmax.f32 %v1382_v44, 0.0  ;;  %v3647_v42 = vor.u32 %v4229_v39, %v3644_v40  ;;  %v4259_v44 = vld [vmem:[#allocation11 + $0x314] sm:$0xf0]  ;;  %v4300_v29 = vld [vmem:[#allocation13 + $0x60] sm:$0xff]  ;;  %v4309_v39 = vld [vmem:[#allocation13 + $0xa8] sm:$0xff] }
 0x195   :  { %2334 = vmatpush.bf16.msra.mxu0 %v3375_v41  ;;  %v3771_v41 = vor.u32 %v4263_v38, %v3770_v36  ;;  %v3755_v49 = vor.u32 %v4259_v44, %v3754_v43  ;;  %v4299_v48 = vld [vmem:[#allocation13 + $0x58] sm:$0xff]  ;;  %v4297_v38 = vld [vmem:[#allocation13 + $0x48] sm:$0xff]  ;;  %v4296_v40 = vld [vmem:[#allocation13 + $0x40] sm:$0xff] }
 0x196   :  { %v4662_v56 = vpack.c.bf16 %v1388_v52, %v1388_v52  ;;  %2343 = vmatpush.bf16.msra.mxu1 %v3567_v45  ;;  %v4225_v45 = vld [vmem:[#allocation11 + $0x20c] sm:$0xf]  ;;  %v3852_v52 = vld [vmem:[#allocation11 + $0x3d8] sm:$0xf0] }
 0x197   :  { %v1370_v63 = vpop.f32.mrf.mxu2  ;;  %2308 = vmatpush.bf16.msrb.mxu2 %v3627_v54  ;;  %v3855_v54 = vor.u32 %v4281_v51, %v3852_v52  ;;  %v4305_v52 = vld [vmem:[#allocation13 + $0x88] sm:$0xff] }
 0x198   :  { %v1383_v4 = vpop.f32.mrf.mxu3  ;;  %2218 = vmatmul.bf16.vlgmr.msrb.gmra.mxu3 %v4662_v56  ;;  %2335 = vmatmul.bf16.vlgmr.msra.gmra.mxu0 %v4646_v61  ;;  %v3519_v61 = vor.u32 %v4197_v10, %v3516_v12  ;;  %v4269_v63 = vld [vmem:[#allocation11 + $0x36c] sm:$0xf] }
 0x199   :  { %2314 = vmatpush.bf16.msrb.mxu3 %v3867_v55  ;;  %v4277_v55 = vld [vmem:[#allocation11 + $0x3ac] sm:$0xf]  ;;  %v3807_v1 = vor.u32 %v4269_v63, %v3804_v0  ;;  %v3788_v4 = vld [vmem:[#allocation11 + $0x358] sm:$0xf0]  ;;  %2647 = vmatpush.bf16.msrb.mxu0 %v4295_v14 }
 0x19a   :  { %2344 = vmatpush.bf16.msra.mxu1 %v3551_v57  ;;  %2309 = vmatmul.bf16.vlgmr.msrb.gmra.mxu2 %v4654_v37  ;;  %v3836_v57 = vld [vmem:[#allocation11 + $0x3b8] sm:$0xf0] }
 0x19b   :  { %2353 = vmatpush.bf16.msra.mxu2 %v3743_v58  ;;  %v3839_v58 = vor.u32 %v4277_v55, %v3836_v57 }
 0x19d   :  { %2315 = vmatpush.bf16.msrb.mxu3 %v3851_v5  ;;  %v3791_v5 = vor.u32 %v4265_v3, %v3788_v4  ;;  %v4317_v4 = vld [vmem:[#allocation13 + $0xe8] sm:$0xff] }
 0x19e   :  { %2345 = vmatpush.bf16.msra.mxu1 %v3535_v6  ;;  %v4261_v6 = vld [vmem:[#allocation11 + $0x32c] sm:$0xf] }
 0x19f   :  { %2354 = vmatpush.bf16.msra.mxu2 %v3727_v7  ;;  %v3772_v7 = vld [vmem:[#allocation11 + $0x338] sm:$0xf0] }
 0x1a0   :  { %v3775_v8 = vor.u32 %v4261_v6, %v3772_v7 }
 0x1a1   :  { %2316 = vmatpush.bf16.msrb.mxu3 %v3835_v15  ;;  %v4294_v15 = vld [vmem:[#allocation13 + $0x30] sm:$0xff] }
 0x1a2   :  { %2346 = vmatpush.bf16.msra.mxu1 %v3519_v61  ;;  %2648 = vmatpush.bf16.msrb.mxu0 %v4294_v15 }
 0x1a3   :  { %2355 = vmatpush.bf16.msra.mxu2 %v3711_v16 }
 0x1a5   :  { %2317 = vmatpush.bf16.msrb.mxu3 %v3819_v23  ;;  %v4302_v23 = vld [vmem:[#allocation13 + $0x70] sm:$0xff] }
 0x1a6   :  { %2347 = vmatpush.bf16.msra.mxu1 %v3503_v24  ;;  %2649 = vmatpush.bf16.msrb.mxu0 %v4293_v18  ;;  %v4314_v18 = vld [vmem:[#allocation13 + $0xd0] sm:$0xff] }
 0x1a7   :  { %2356 = vmatpush.bf16.msra.mxu2 %v3695_v25 }
 0x1a8   :  { %2270 = vmatmul.bf16.vlgmr.msra.gmra.mxu3 %v4662_v56 }
 0x1a9   :  { %2318 = vmatpush.bf16.msrb.mxu3 %v3803_v30  ;;  %2348 = vmatmul.bf16.vlgmr.msra.gmra.mxu1 %v4649_v11  ;;  %v3631_v11 = vor.u32 %v4225_v45, %v3628_v17  ;;  %v4307_v17 = vld [vmem:[#allocation13 + $0x98] sm:$0xff] }
 0x1aa   :  { %2650 = vmatpush.bf16.msrb.mxu0 %v4292_v19  ;;  %2660 = vmatpush.bf16.msrb.mxu1 %v4303_v22 }
 0x1ab   :  { %2357 = vmatpush.bf16.msra.mxu2 %v3679_v31 }
 0x1ad   :  { %2319 = vmatpush.bf16.msrb.mxu3 %v3787_v34  ;;  %v4310_v34 = vld [vmem:[#allocation13 + $0xb0] sm:$0xff] }
 0x1ae   :  { %2651 = vmatpush.bf16.msrb.mxu0 %v4291_v21  ;;  %2661 = vmatpush.bf16.msrb.mxu1 %v4302_v23 }
 0x1af   :  { %2358 = vmatpush.bf16.msra.mxu2 %v3663_v35 }
 0x1b1   :  { %2320 = vmatpush.bf16.msrb.mxu3 %v3771_v41  ;;  %v4308_v41 = vld [vmem:[#allocation13 + $0xa0] sm:$0xff] }
 0x1b2   :  { %2662 = vmatpush.bf16.msrb.mxu1 %v4301_v27 }
 0x1b3   :  { %2359 = vmatpush.bf16.msra.mxu2 %v3647_v42  ;;  %v4683_v42 = vld [vmem:[%s4705_s6] sm:$0xf] }
 0x1b4   :  { %v1523_v45 = vperm.slane %v4683_v42, 0  ;;  %v1524_v0 = vperm.slane %v4683_v42, 1  ;;  %v1525_v19 = vperm.slane %v4683_v42, 2 }
 0x1b5   :  { %2321 = vmatpush.bf16.msrb.mxu3 %v3755_v49 }
 0x1b6   :  { %2663 = vmatpush.bf16.msrb.mxu1 %v4300_v29 }
 0x1b7   :  { %2360 = vmatpush.bf16.msra.mxu2 %v3631_v11 }
 0x1b8   :  { %2322 = vmatmul.bf16.vlgmr.msrb.gmra.mxu3 %v4662_v56 }
 0x1b9   :  { %2366 = vmatpush.bf16.msra.mxu3 %v3871_v50 }
 0x1ba   :  { %2361 = vmatmul.bf16.vlgmr.msra.gmra.mxu2 %v4654_v37  ;;  %v3756_v37 = vld [vmem:[#allocation11 + $0x318] sm:$0xf0]  ;;  %2664 = vmatpush.bf16.msrb.mxu1 %v4299_v48 }
 0x1bb   :  { %v3759_v10 = vor.u32 %v4257_v9, %v3756_v37  ;;  %2673 = vmatpush.bf16.msrb.mxu2 %v4311_v33  ;;  %v4316_v9 = vld [vmem:[#allocation13 + $0xe0] sm:$0xff] }
 0x1bd   :  { %2367 = vmatpush.bf16.msra.mxu3 %v3855_v54 }
 0x1be   :  { %2665 = vmatpush.bf16.msrb.mxu1 %v4298_v53 }
 0x1bf   :  { %2674 = vmatpush.bf16.msrb.mxu2 %v4310_v34 }
 0x1c1   :  { %2368 = vmatpush.bf16.msra.mxu3 %v3839_v58 }
 0x1c2   :  { %2666 = vmatpush.bf16.msrb.mxu1 %v4297_v38 }
 0x1c3   :  { %2675 = vmatpush.bf16.msrb.mxu2 %v4309_v39 }
 0x1c5   :  { %2369 = vmatpush.bf16.msra.mxu3 %v3823_v62 }
 0x1c6   :  { %2667 = vmatpush.bf16.msrb.mxu1 %v4296_v40 }
 0x1c7   :  { %2676 = vmatpush.bf16.msrb.mxu2 %v4308_v41 }
 0x1c9   :  { %2370 = vmatpush.bf16.msra.mxu3 %v3807_v1  ;;  %v4318_v1 = vld [vmem:[#allocation13 + $0xf0] sm:$0xff] }
 0x1cb   :  { %2677 = vmatpush.bf16.msrb.mxu2 %v4307_v17 }
 0x1cd   :  { %2371 = vmatpush.bf16.msra.mxu3 %v3791_v5 }
 0x1cf   :  { %2678 = vmatpush.bf16.msrb.mxu2 %v4306_v46 }
 0x1d1   :  { %2372 = vmatpush.bf16.msra.mxu3 %v3775_v8 }
 0x1d3   :  { %2679 = vmatpush.bf16.msrb.mxu2 %v4305_v52 }
 0x1d5   :  { %2373 = vmatpush.bf16.msra.mxu3 %v3759_v10  ;;  %v2180_v12 = vpop.f32.mrf.mxu0 }
 0x1d6   :  { %v2181_v49 = vadd.f32 %v2180_v12, %v1523_v45  ;;  %v4332_v45 = vld [vmem:[%s4707_s8] ss:$0 sm:$0xff] }
 0x1d7   :  { %2680 = vmatpush.bf16.msrb.mxu2 %v4304_v59 }
 0x1d8   :  { %2374 = vmatmul.bf16.vlgmr.msra.gmra.mxu3 %v4662_v56  ;;  %v4290_v56 = vld [vmem:[#allocation13 + $0x10] sm:$0xff] }
 0x1d9   :  { %2652 = vmatpush.bf16.msrb.mxu0 %v4290_v56  ;;  %2686 = vmatpush.bf16.msrb.mxu3 %v4319_v60  ;;  %v4312_v56 = vld [vmem:[#allocation13 + $0xc0] sm:$0xff] }
 0x1dd   :  { %v2182_v13 = vpop.f32.mrf.mxu0  ;;  %2653 = vmatpush.bf16.msrb.mxu0 %v4289_v26  ;;  %2687 = vmatpush.bf16.msrb.mxu3 %v4318_v1 }
 0x1de   :  { %v4315_v13 = vld [vmem:[#allocation13 + $0xd8] sm:$0xff] }
 0x1e1   :  { %2654 = vmatpush.bf16.msrb.mxu0 %v4288_v28  ;;  %2688 = vmatpush.bf16.msrb.mxu3 %v4317_v4 }
 0x1e5   :  { %v2193_v61 = vpop.f32.mrf.mxu1  ;;  %v4672_v16 = vpop.f32.mrf.mxu0  ;;  %2689 = vmatpush.bf16.msrb.mxu3 %v4316_v9 }
 0x1e6   :  { %v2194_v50 = vadd.f32 %v2193_v61, %v2181_v49  ;;  %v2233_v5 = vadd.f32 %v4672_v16, %v1524_v0 }
 0x1e9   :  { %2690 = vmatpush.bf16.msrb.mxu3 %v4315_v13 }
 0x1ed   :  { %v2195_v20 = vpop.f32.mrf.mxu1  ;;  %v2234_v2 = vpop.f32.mrf.mxu0  ;;  %2691 = vmatpush.bf16.msrb.mxu3 %v4314_v18 }
 0x1ee   :  { %v4313_v2 = vld [vmem:[#allocation13 + $0xc8] sm:$0xff] }
 0x1f1   :  { %2692 = vmatpush.bf16.msrb.mxu3 %v4313_v2 }
 0x1f5   :  { %v4674_v24 = vpop.f32.mrf.mxu1  ;;  %v4676_v25 = vpop.f32.mrf.mxu0  ;;  %2693 = vmatpush.bf16.msrb.mxu3 %v4312_v56 }
 0x1f6   :  { %v2246_v8 = vadd.f32 %v4674_v24, %v2233_v5  ;;  %v2285_v20 = vadd.f32 %v4676_v25, %v1525_v19 }
 0x1fc   :  { %v2206_v30 = vpop.f32.mrf.mxu2 }
 0x1fd   :  { %v2247_v31 = vpop.f32.mrf.mxu1  ;;  %v2286_v32 = vpop.f32.mrf.mxu0  ;;  %v2207_v51 = vadd.f32 %v2206_v30, %v2194_v50 }
 0x1fe   :  { %v1526_v31 = vperm.slane %v4683_v42, 3 }
 0x204   :  { %v2208_v35 = vpop.f32.mrf.mxu2 }
 0x206   :  { %v4678_v36 = vpop.f32.mrf.mxu1 }
 0x207   :  { %v2298_v21 = vadd.f32 %v4678_v36, %v2285_v20 }
 0x20d   :  { %v2258_v43 = vpop.f32.mrf.mxu2 }
 0x20e   :  { %v2299_v44 = vpop.f32.mrf.mxu1  ;;  %v2259_v37 = vadd.f32 %v2258_v43, %v2246_v8 }
 0x215   :  { %v2336_v47 = vpop.f32.mrf.mxu0  ;;  %v2260_v11 = vpop.f32.mrf.mxu2 }
 0x216   :  { %v2337_v32 = vadd.f32 %v2336_v47, %v1526_v31 }
 0x21b   :  { %v2219_v54 = vpop.f32.mrf.mxu3 }
 0x21c   :  { %v2220_v55 = vadd.f32 %v2219_v54, %v2207_v51 }
 0x21d   :  { %v2338_v57 = vpop.f32.mrf.mxu0  ;;  %v2310_v62 = vpop.f32.mrf.mxu2 }
 0x21e   :  { %v2379_v58 = vmax.f32 %v2220_v55, 0.0  ;;  %v2311_v22 = vadd.f32 %v2310_v62, %v2298_v21 }
 0x220   :  { %v2383_v63 = vpack.c.bf16 %v2379_v58, %v2379_v58 }
 0x222   :  { %2655 = vmatmul.bf16.vlgmr.msrb.gmra.mxu0 %v2383_v63 }
 0x223   :  { %v2221_v3 = vpop.f32.mrf.mxu3 }
 0x225   :  { %v2312_v7 = vpop.f32.mrf.mxu2 }
 0x226   :  { %v2349_v6 = vpop.f32.mrf.mxu1 }
 0x227   :  { %v2350_v48 = vadd.f32 %v2349_v6, %v2337_v32 }
 0x22b   :  { %v2271_v10 = vpop.f32.mrf.mxu3 }
 0x22c   :  { %v2272_v12 = vadd.f32 %v2271_v10, %v2259_v37 }
 0x22e   :  { %v2380_v14 = vmax.f32 %v2272_v12, 0.0  ;;  %v2351_v15 = vpop.f32.mrf.mxu1 }
 0x230   :  { %v2384_v61 = vpack.c.bf16 %v2380_v14, %v2380_v14 }
 0x232   :  { %2668 = vmatmul.bf16.vlgmr.msrb.gmra.mxu1 %v2384_v61 }
 0x233   :  { %v2273_v16 = vpop.f32.mrf.mxu3 }
 0x23b   :  { %v2323_v23 = vpop.f32.mrf.mxu3 }
 0x23c   :  { %v2324_v24 = vadd.f32 %v2323_v23, %v2311_v22 }
 0x23d   :  { %v2362_v26 = vpop.f32.mrf.mxu2 }
 0x23e   :  { %v2381_v27 = vmax.f32 %v2324_v24, 0.0  ;;  %v2363_v25 = vadd.f32 %v2362_v26, %v2350_v48 }
 0x240   :  { %v2385_v28 = vpack.c.bf16 %v2381_v27, %v2381_v27 }
 0x242   :  { %2681 = vmatmul.bf16.vlgmr.msrb.gmra.mxu2 %v2385_v28 }
 0x243   :  { %v2325_v29 = vpop.f32.mrf.mxu3 }
 0x245   :  { %v2364_v30 = vpop.f32.mrf.mxu2 }
 0x25b   :  { %v2375_v33 = vpop.f32.mrf.mxu3 }
 0x25c   :  { %v2376_v53 = vadd.f32 %v2375_v33, %v2363_v25 }
 0x25e   :  { %v2382_v34 = vmax.f32 %v2376_v53, 0.0 }
 0x260   :  { %v2386_v35 = vpack.c.bf16 %v2382_v34, %v2382_v34 }
 0x262   :  { %2694 = vmatmul.bf16.vlgmr.msrb.gmra.mxu3 %v2386_v35 }
 0x263   :  { %v2377_v36 = vpop.f32.mrf.mxu3 }
 0x29f   :  { %v2656_v38 = vpop.f32.mrf.mxu0 }
 0x2a0   :  { %v2657_v42 = vadd.f32 %v4332_v45, %v2656_v38 }
 0x2a7   :  { %v2658_v39 = vpop.f32.mrf.mxu0 }
 0x2af   :  { %v2669_v40 = vpop.f32.mrf.mxu1 }
 0x2b0   :  { %v2670_v17 = vadd.f32 %v2669_v40, %v2657_v42 }
 0x2b7   :  { %v2671_v41 = vpop.f32.mrf.mxu1 }
 0x2c5   :  { %v2682_v43 = vpop.f32.mrf.mxu2 }
 0x2c6   :  { %v2683_v46 = vadd.f32 %v2682_v43, %v2670_v17 }
 0x2cd   :  { %v2684_v44 = vpop.f32.mrf.mxu2 }
 0x2e5   :  { %v2695_v47 = vpop.f32.mrf.mxu3 }
 0x2e6   :  { %v2696_v49 = vadd.f32 %v2695_v47, %v2683_v46 }
 0x2e8   :  { %2699 = vst [vmem:[#allocation14] sm:$0xff] %v2696_v49 }
 0x2e9   :  { %2710 = dma.vmem_to_hbm [thread:$0]  %s2706_s1, 128, %s2708_s26, [#allocation4]  }
 0x2ed   :  { %v2697_v11 = vpop.f32.mrf.mxu3 }
 0x2ee   :  { %4533 = dma.done.wait [#allocation4], 128  }
 0x2ef   :  { %4534 = vsyncadd [#allocation4], 4294967168 }
 0x2f0   :  { %2715 = vsyncpa [#allocation3], 1 }
 0x2f1   :  { %2716 = vsyncpa [#allocation6], 1 }
 0x2f2   :  { %2717 = vsyncpa [#allocation9], 1 }
 0x2f3   :  { %2718 = vsyncpa [#allocation12], 1 }
 0x2f4   :  { %2719 = vsyncpa [#allocation4], 1 }

</bundles_post_ra>
